<compile_context>
chip_gen: v7x
topology: tpu7x:2x2x1
jax: 0.10.0
libtpu: 0.0.40
codegen_flags: <defaults>
</compile_context>

<pallas_src>
import functools
import math

import jax
import jax.numpy as jnp
from jax.experimental import pallas as pl
from jax.experimental.pallas import tpu as pltpu


# ------------------------------ model config -------------------------------

VOCAB = 100
MAX_POS = 16
TYPE_VOCAB = 2
HIDDEN = 32
INTERMEDIATE = 64
NUM_HEADS = 2
NUM_LAYERS = 2
NUM_LABELS = 3          # len(FLAGS.classes)

MXU_DTYPE = jnp.bfloat16   # bf16 MXU operands (encoder), f32 accumulation

# Embedding-slab row offsets (kept sublane-aligned: pos @ 0, type @ 16, word @ 24).
_POS_OFF = 0
_TYPE_OFF = MAX_POS
_WORD_OFF = MAX_POS + 8
_EMB_ROWS = _WORD_OFF + VOCAB


# ----------------------------- kernel helpers ------------------------------


def _gelu_tanh(y):
    return 0.5 * y * (1.0 + jnp.tanh(0.7978845608028654 * (y + 0.044715 * y * y * y)))


def _layernorm(x, g, b, eps=1e-12):
    mu = jnp.mean(x, axis=-1, keepdims=True)
    var = jnp.mean((x - mu) * (x - mu), axis=-1, keepdims=True)
    return (x - mu) * jax.lax.rsqrt(var + eps) * g + b


def _bf16_dot(a, b):
    # (M, K) @ (K, N) with bf16 operands, f32 accumulation.
    return jnp.dot(a.astype(MXU_DTYPE), b.astype(MXU_DTYPE),
                   preferred_element_type=jnp.float32)


def _bf16_dot_nt(a, b):
    # Contract the shared LAST dim: (M, K) . (N, K) -> (M, N); no explicit transpose.
    return jax.lax.dot_general(
        a.astype(MXU_DTYPE), b.astype(MXU_DTYPE),
        dimension_numbers=(((1,), (1,)), ((), ())),
        preferred_element_type=jnp.float32)


# ----------------------------- fused Pallas kernel --------------------------


def fused_bert_kernel(
    # inputs
    ints_ref,        # (B*S, 4) int32: [input_ids | token_type_ids | labels(padded) | 0]
    attn_bias_ref,   # (B*S, B*S) f32: HF key mask + block-diagonal document mask
    emb_ref,         # (_EMB_ROWS, H) f32: pos | type | word embedding tables
    vech_ref,        # (15, H) f32: LN gammas/betas + hidden-sized biases + pool_b
    vecw_ref,        # (2L+1, 3H) f32: qkv_b | ff1_b (padded) | cls_b (padded)
    qkv_w_ref,       # (L, H, 3H) bf16
    o_w_ref,         # (L, H, H) bf16
    ff1_w_ref,       # (L, H, I) bf16
    ff2_w_ref,       # (L, I, H) bf16
    pc_w_ref,        # (H, H+C) f32: pool_w | cls_w
    # outputs
    loss_ref,        # (1, 1) f32
    probs_ref,       # (B, C) f32
    *, B, S, H, NH, DH, L, I, C, V, scale,
):
    BS = B * S

    # ---------------- embeddings (one-hot built in-kernel via iota compare) ----------
    ids = ints_ref[:, 0:1]                                              # (BS, 1) int32
    word_oh = (jax.lax.broadcasted_iota(jnp.int32, (BS, V), 1) == ids).astype(jnp.float32)
    # f32 one-hot matmul -> exact table rows.
    x = jnp.dot(word_oh, emb_ref[_WORD_OFF:_WORD_OFF + V, :],
                preferred_element_type=jnp.float32)                     # (BS, H)

    pos = emb_ref[_POS_OFF:_POS_OFF + S, :]                             # (S, H)
    x = x + jnp.concatenate([pos] * B, axis=0)                          # tile over batch

    t0 = emb_ref[_TYPE_OFF:_TYPE_OFF + 1, :]                            # (1, H)
    t1 = emb_ref[_TYPE_OFF + 1:_TYPE_OFF + 2, :]
    types = ints_ref[:, 1:2].astype(jnp.float32)                        # (BS, 1) in {0, 1}
    x = x + t0 + types * (t1 - t0)                                      # VPU select, no matmul

    x = _layernorm(x, vech_ref[0:1, :], vech_ref[1:2, :])

    bias = attn_bias_ref[...]                                           # (BS, BS)

    # ---------------- encoder layers (static unrolled, all VMEM/vreg resident) -------
    for l in range(L):
        r = 2 + 6 * l
        ln1_g = vech_ref[r + 0:r + 1, :]
        ln1_b = vech_ref[r + 1:r + 2, :]
        ln2_g = vech_ref[r + 2:r + 3, :]
        ln2_b = vech_ref[r + 3:r + 4, :]
        o_b = vech_ref[r + 4:r + 5, :]
        ff2_b = vech_ref[r + 5:r + 6, :]
        qkv_b = vecw_ref[l:l + 1, :]                                     # (1, 3H)
        ff1_b = vecw_ref[L + l:L + l + 1, 0:I]                           # (1, I)

        qkv = _bf16_dot(x, qkv_w_ref[l]) + qkv_b                         # (BS, 3H)
        q = qkv[:, 0:H] * scale                                          # fold 1/sqrt(DH) into q
        k = qkv[:, H:2 * H]
        v = qkv[:, 2 * H:3 * H]

        # Block-diagonal attention: one (BS, BS) pass per head, batch loop collapsed.
        ctx_heads = []
        for h in range(NH):
            cols = slice(h * DH, (h + 1) * DH)
            s = _bf16_dot_nt(q[:, cols], k[:, cols]) + bias              # (BS, BS)
            s = s - jnp.max(s, axis=-1, keepdims=True)
            p = jnp.exp(s)
            p = p * pl.reciprocal(jnp.sum(p, axis=-1, keepdims=True), approx=True)
            ctx_heads.append(_bf16_dot(p, v[:, cols]))                   # (BS, DH)
        ctx = jnp.concatenate(ctx_heads, axis=-1)                        # (BS, H), registers only

        attn = _bf16_dot(ctx, o_w_ref[l]) + o_b
        x = _layernorm(attn + x, ln1_g, ln1_b)

        hmid = _gelu_tanh(_bf16_dot(x, ff1_w_ref[l]) + ff1_b)
        hout = _bf16_dot(hmid, ff2_w_ref[l]) + ff2_b
        x = _layernorm(hout + x, ln2_g, ln2_b)

    # ---------------- pooler + classifier (f32 for output fidelity) -------------------
    pool_b = vech_ref[2 + 6 * L:2 + 6 * L + 1, :]
    cls_b = vecw_ref[2 * L:2 * L + 1, 0:C]
    pool_w = pc_w_ref[:, 0:H]
    cls_w = pc_w_ref[:, H:H + C]

    cls_tok = jnp.concatenate([x[b * S:b * S + 1, :] for b in range(B)], axis=0)  # (B, H)
    pooled = jnp.tanh(jnp.dot(cls_tok, pool_w, preferred_element_type=jnp.float32) + pool_b)
    logits = jnp.dot(pooled, cls_w, preferred_element_type=jnp.float32) + cls_b   # (B, C)

    # ---------------- cross-entropy loss (mean over batch) ----------------------------
    lab = ints_ref[0:B, 2:3]                                             # (B, 1) int32
    labels_oh = (jax.lax.broadcasted_iota(jnp.int32, (B, C), 1) == lab).astype(jnp.float32)
    m = jnp.max(logits, axis=-1, keepdims=True)
    lse = jnp.log(jnp.sum(jnp.exp(logits - m), axis=-1, keepdims=True)) + m        # (B, 1)
    picked = jnp.sum(labels_oh * logits, axis=-1, keepdims=True)                   # (B, 1)
    loss_ref[...] = jnp.mean(lse - picked, axis=(0, 1), keepdims=True)             # (1, 1)

    # ---------------- softmax over dim 0 of logits.squeeze() --------------------------
    m0 = jnp.max(logits, axis=0, keepdims=True)
    e0 = jnp.exp(logits - m0)
    probs_ref[...] = e0 / jnp.sum(e0, axis=0, keepdims=True)


# ------------------------------ parameters -----------------------------------


def init_params(key):
    s = 0.02
    keys = jax.random.split(key, 6)
    lk = jax.random.split(keys[5], 4)
    L, H, I = NUM_LAYERS, HIDDEN, INTERMEDIATE

    def rnd(k, shape):
        return jax.random.normal(k, shape, jnp.float32) * s

    return dict(
        word_emb=rnd(keys[0], (VOCAB, H)),
        pos_emb=rnd(keys[1], (MAX_POS, H)),
        type_emb=rnd(keys[2], (TYPE_VOCAB, H)),
        emb_ln_g=jnp.ones((1, H), jnp.float32),
        emb_ln_b=jnp.zeros((1, H), jnp.float32),
        qkv_w=rnd(lk[0], (L, H, 3 * H)),
        qkv_b=jnp.zeros((L, 1, 3 * H), jnp.float32),
        o_w=rnd(lk[1], (L, H, H)),
        o_b=jnp.zeros((L, 1, H), jnp.float32),
        ln1_g=jnp.ones((L, 1, H), jnp.float32),
        ln1_b=jnp.zeros((L, 1, H), jnp.float32),
        ff1_w=rnd(lk[2], (L, H, I)),
        ff1_b=jnp.zeros((L, 1, I), jnp.float32),
        ff2_w=rnd(lk[3], (L, I, H)),
        ff2_b=jnp.zeros((L, 1, H), jnp.float32),
        ln2_g=jnp.ones((L, 1, H), jnp.float32),
        ln2_b=jnp.zeros((L, 1, H), jnp.float32),
        pool_w=rnd(keys[3], (H, H)),
        pool_b=jnp.zeros((1, H), jnp.float32),
        cls_w=rnd(keys[4], (H, NUM_LABELS)),
        cls_b=jnp.zeros((1, NUM_LABELS), jnp.float32),
    )


def pack_params(p):
    """One-time host-side packing: few DMA slabs, bf16 encoder weights."""
    L, H, I = NUM_LAYERS, HIDDEN, INTERMEDIATE

    emb = jnp.zeros((_EMB_ROWS, H), jnp.float32)
    emb = emb.at[_POS_OFF:_POS_OFF + MAX_POS].set(p["pos_emb"])
    emb = emb.at[_TYPE_OFF:_TYPE_OFF + TYPE_VOCAB].set(p["type_emb"])
    emb = emb.at[_WORD_OFF:_WORD_OFF + VOCAB].set(p["word_emb"])

    rows = [p["emb_ln_g"], p["emb_ln_b"]]
    for l in range(L):
        rows += [p["ln1_g"][l], p["ln1_b"][l], p["ln2_g"][l], p["ln2_b"][l],
                 p["o_b"][l], p["ff2_b"][l]]
    rows.append(p["pool_b"])
    vec_h = jnp.concatenate(rows, axis=0)                                 # (15, H)

    W = 3 * H

    def pad_w(a):
        return jnp.pad(a, ((0, 0), (0, W - a.shape[-1])))

    wide = ([p["qkv_b"][l] for l in range(L)]
            + [pad_w(p["ff1_b"][l]) for l in range(L)]
            + [pad_w(p["cls_b"])])
    vec_w = jnp.concatenate(wide, axis=0)                                 # (2L+1, 3H)

    return dict(
        emb=emb, vec_h=vec_h, vec_w=vec_w,
        qkv_w=p["qkv_w"].astype(MXU_DTYPE),
        o_w=p["o_w"].astype(MXU_DTYPE),
        ff1_w=p["ff1_w"].astype(MXU_DTYPE),
        ff2_w=p["ff2_w"].astype(MXU_DTYPE),
        pc_w=jnp.concatenate([p["pool_w"], p["cls_w"]], axis=-1),         # (H, H+C) f32
    )


# ------------------------------ forward pass ----------------------------------


def document_level_bert_forward(packed, input_ids, attention_mask, token_type_ids, labels):
    """Returns (loss, softmax_dim0(logits.squeeze())) like documentLevelBert.forward."""
    B, S = input_ids.shape
    BS = B * S

    # Tiny per-call glue: pack ints into one array, build the block-diagonal attention bias.
    ids = input_ids.astype(jnp.int32).reshape(BS, 1)
    typ = token_type_ids.astype(jnp.int32).reshape(BS, 1)
    lab = jnp.pad(labels.astype(jnp.int32), (0, BS - B)).reshape(BS, 1)
    ints = jnp.concatenate([ids, typ, lab, jnp.zeros((BS, 1), jnp.int32)], axis=1)  # (BS, 4)

    qb = jnp.arange(BS, dtype=jnp.int32) // S
    same_doc = qb[:, None] == qb[None, :]
    key_bias = (1.0 - attention_mask.astype(jnp.float32).reshape(1, BS)) * -10000.0
    attn_bias = jnp.where(same_doc, key_bias, -1e9).astype(jnp.float32)              # (BS, BS)

    kernel = functools.partial(
        fused_bert_kernel,
        B=B, S=S, H=HIDDEN, NH=NUM_HEADS, DH=HIDDEN // NUM_HEADS,
        L=NUM_LAYERS, I=INTERMEDIATE, C=NUM_LABELS, V=VOCAB,
        scale=1.0 / math.sqrt(HIDDEN // NUM_HEADS))

    vmem = pl.BlockSpec(memory_space=pltpu.MemorySpace.VMEM)
    inputs = (ints, attn_bias, packed["emb"], packed["vec_h"], packed["vec_w"],
              packed["qkv_w"], packed["o_w"], packed["ff1_w"], packed["ff2_w"],
              packed["pc_w"])

    loss, probs = pl.pallas_call(
        kernel,
        out_shape=(jax.ShapeDtypeStruct((1, 1), jnp.float32),
                   jax.ShapeDtypeStruct((B, NUM_LABELS), jnp.float32)),
        in_specs=[vmem] * len(inputs),
        out_specs=(vmem, vmem),
    )(*inputs)

    return loss[0, 0], probs


# ---------------------------------- main ---------------------------------------

if __name__ == "__main__":
    key = jax.random.PRNGKey(0)
    k_param, k_ids, k_type, k_lab = jax.random.split(key, 4)

    B, S = 2, 8
    params = init_params(k_param)
    packed = pack_params(params)   # one-time packing (not part of the per-call path)

    input_ids = jax.random.randint(k_ids, (B, S), 0, VOCAB, dtype=jnp.int32)
    attention_mask = jnp.ones((B, S), dtype=jnp.int32)
    token_type_ids = jax.random.randint(k_type, (B, S), 0, TYPE_VOCAB, dtype=jnp.int32)
    labels = jax.random.randint(k_lab, (B,), 0, NUM_LABELS, dtype=jnp.int32)

    fwd = jax.jit(document_level_bert_forward)
    loss, probs = fwd(packed, input_ids, attention_mask, token_type_ids, labels)
    jax.block_until_ready((loss, probs))

    assert loss.shape == ()
    assert probs.shape == (B, NUM_LABELS)
    print("KERNEL_OK")
</pallas_src>

<mosaic_0001>
module attributes {stable_mosaic.version = 11 : i64} {
  func.func @fused_bert_kernel(%arg0: memref<16x4xi32, #tpu.memory_space<vmem>>, %arg1: memref<16x16xf32, #tpu.memory_space<vmem>>, %arg2: memref<124x32xf32, #tpu.memory_space<vmem>>, %arg3: memref<15x32xf32, #tpu.memory_space<vmem>>, %arg4: memref<5x96xf32, #tpu.memory_space<vmem>>, %arg5: memref<2x32x96xbf16, #tpu.memory_space<vmem>>, %arg6: memref<2x32x32xbf16, #tpu.memory_space<vmem>>, %arg7: memref<2x32x64xbf16, #tpu.memory_space<vmem>>, %arg8: memref<2x64x32xbf16, #tpu.memory_space<vmem>>, %arg9: memref<32x35xf32, #tpu.memory_space<vmem>>, %arg10: memref<1x1xf32, #tpu.memory_space<vmem>>, %arg11: memref<2x3xf32, #tpu.memory_space<vmem>>) attributes {dimension_semantics = [], scalar_prefetch = 0 : i64, scratch_operands = 0 : i64, tpu.core_type = #tpu.core_type<tc>} {
    %c0 = arith.constant 0 : index
    %c0_0 = arith.constant 0 : index
    %0 = vector.load %arg0[%c0, %c0_0] : memref<16x4xi32, #tpu.memory_space<vmem>>, vector<16x1xi32>
    %1 = tpu.iota {dimensions = array<i32: 1>} : vector<16x100xi32>
    %2 = vector.broadcast %0 : vector<16x1xi32> to vector<16x100xi32>
    %3 = arith.cmpi eq, %1, %2 : vector<16x100xi32>
    %4 = arith.extui %3 : vector<16x100xi1> to vector<16x100xi32>
    %5 = arith.sitofp %4 : vector<16x100xi32> to vector<16x100xf32>
    %c24 = arith.constant 24 : index
    %c0_1 = arith.constant 0 : index
    %6 = vector.load %arg2[%c24, %c0_1] : memref<124x32xf32, #tpu.memory_space<vmem>>, vector<100x32xf32>
    %cst = arith.constant dense<0.000000e+00> : vector<16x32xf32>
    %7 = tpu.matmul %5, %6, %cst {dimension_numbers = #tpu.dot_dimension_numbers<[1], [0], [0], [1], [0, 0, 1, 1], [], []>} : vector<16x100xf32>, vector<100x32xf32>, vector<16x32xf32> -> vector<16x32xf32>
    %c0_2 = arith.constant 0 : index
    %c0_3 = arith.constant 0 : index
    %8 = vector.load %arg2[%c0_2, %c0_3] : memref<124x32xf32, #tpu.memory_space<vmem>>, vector<8x32xf32>
    %9 = tpu.concatenate %8, %8 in 0 : vector<8x32xf32>, vector<8x32xf32> -> vector<16x32xf32>
    %10 = arith.addf %7, %9 : vector<16x32xf32>
    %c16 = arith.constant 16 : index
    %c0_4 = arith.constant 0 : index
    %11 = vector.load %arg2[%c16, %c0_4] : memref<124x32xf32, #tpu.memory_space<vmem>>, vector<1x32xf32>
    %c17 = arith.constant 17 : index
    %c0_5 = arith.constant 0 : index
    %12 = vector.load %arg2[%c17, %c0_5] : memref<124x32xf32, #tpu.memory_space<vmem>>, vector<1x32xf32>
    %c0_6 = arith.constant 0 : index
    %c1 = arith.constant 1 : index
    %13 = vector.load %arg0[%c0_6, %c1] : memref<16x4xi32, #tpu.memory_space<vmem>>, vector<16x1xi32>
    %14 = arith.sitofp %13 : vector<16x1xi32> to vector<16x1xf32>
    %15 = vector.broadcast %11 : vector<1x32xf32> to vector<16x32xf32>
    %16 = arith.addf %10, %15 : vector<16x32xf32>
    %17 = arith.subf %12, %11 : vector<1x32xf32>
    %18 = vector.broadcast %14 : vector<16x1xf32> to vector<16x32xf32>
    %19 = vector.broadcast %17 : vector<1x32xf32> to vector<16x32xf32>
    %20 = arith.mulf %18, %19 : vector<16x32xf32>
    %21 = arith.addf %16, %20 : vector<16x32xf32>
    %c0_7 = arith.constant 0 : index
    %c0_8 = arith.constant 0 : index
    %22 = vector.load %arg3[%c0_7, %c0_8] : memref<15x32xf32, #tpu.memory_space<vmem>>, vector<1x32xf32>
    %c1_9 = arith.constant 1 : index
    %c0_10 = arith.constant 0 : index
    %23 = vector.load %arg3[%c1_9, %c0_10] : memref<15x32xf32, #tpu.memory_space<vmem>>, vector<1x32xf32>
    %cst_11 = arith.constant dense<0.000000e+00> : vector<16xf32>
    %24 = vector.multi_reduction <add>, %21, %cst_11 [1] : vector<16x32xf32> to vector<16xf32>
    %25 = vector.shape_cast %24 : vector<16xf32> to vector<16x1xf32>
    %cst_12 = arith.constant 3.200000e+01 : f32
    %26 = vector.broadcast %cst_12 : f32 to vector<16x1xf32>
    %27 = arith.divf %25, %26 : vector<16x1xf32>
    %28 = vector.broadcast %27 : vector<16x1xf32> to vector<16x32xf32>
    %29 = arith.subf %21, %28 : vector<16x32xf32>
    %30 = vector.broadcast %27 : vector<16x1xf32> to vector<16x32xf32>
    %31 = arith.subf %21, %30 : vector<16x32xf32>
    %32 = arith.mulf %29, %31 : vector<16x32xf32>
    %cst_13 = arith.constant dense<0.000000e+00> : vector<16xf32>
    %33 = vector.multi_reduction <add>, %32, %cst_13 [1] : vector<16x32xf32> to vector<16xf32>
    %34 = vector.shape_cast %33 : vector<16xf32> to vector<16x1xf32>
    %cst_14 = arith.constant 3.200000e+01 : f32
    %35 = vector.broadcast %cst_14 : f32 to vector<16x1xf32>
    %36 = arith.divf %34, %35 : vector<16x1xf32>
    %37 = vector.broadcast %27 : vector<16x1xf32> to vector<16x32xf32>
    %38 = arith.subf %21, %37 : vector<16x32xf32>
    %cst_15 = arith.constant 9.99999996E-13 : f32
    %39 = vector.broadcast %cst_15 : f32 to vector<16x1xf32>
    %40 = arith.addf %36, %39 : vector<16x1xf32>
    %41 = math.rsqrt %40 : vector<16x1xf32>
    %42 = vector.broadcast %41 : vector<16x1xf32> to vector<16x32xf32>
    %43 = arith.mulf %38, %42 : vector<16x32xf32>
    %44 = vector.broadcast %22 : vector<1x32xf32> to vector<16x32xf32>
    %45 = arith.mulf %43, %44 : vector<16x32xf32>
    %46 = vector.broadcast %23 : vector<1x32xf32> to vector<16x32xf32>
    %47 = arith.addf %45, %46 : vector<16x32xf32>
    %c0_16 = arith.constant 0 : index
    %c0_17 = arith.constant 0 : index
    %48 = vector.load %arg1[%c0_16, %c0_17] : memref<16x16xf32, #tpu.memory_space<vmem>>, vector<16x16xf32>
    %c2 = arith.constant 2 : index
    %c0_18 = arith.constant 0 : index
    %49 = vector.load %arg3[%c2, %c0_18] : memref<15x32xf32, #tpu.memory_space<vmem>>, vector<1x32xf32>
    %c3 = arith.constant 3 : index
    %c0_19 = arith.constant 0 : index
    %50 = vector.load %arg3[%c3, %c0_19] : memref<15x32xf32, #tpu.memory_space<vmem>>, vector<1x32xf32>
    %c4 = arith.constant 4 : index
    %c0_20 = arith.constant 0 : index
    %51 = vector.load %arg3[%c4, %c0_20] : memref<15x32xf32, #tpu.memory_space<vmem>>, vector<1x32xf32>
    %c5 = arith.constant 5 : index
    %c0_21 = arith.constant 0 : index
    %52 = vector.load %arg3[%c5, %c0_21] : memref<15x32xf32, #tpu.memory_space<vmem>>, vector<1x32xf32>
    %c6 = arith.constant 6 : index
    %c0_22 = arith.constant 0 : index
    %53 = vector.load %arg3[%c6, %c0_22] : memref<15x32xf32, #tpu.memory_space<vmem>>, vector<1x32xf32>
    %c7 = arith.constant 7 : index
    %c0_23 = arith.constant 0 : index
    %54 = vector.load %arg3[%c7, %c0_23] : memref<15x32xf32, #tpu.memory_space<vmem>>, vector<1x32xf32>
    %c0_24 = arith.constant 0 : index
    %c0_25 = arith.constant 0 : index
    %55 = vector.load %arg4[%c0_24, %c0_25] : memref<5x96xf32, #tpu.memory_space<vmem>>, vector<1x96xf32>
    %c2_26 = arith.constant 2 : index
    %c0_27 = arith.constant 0 : index
    %56 = vector.load %arg4[%c2_26, %c0_27] : memref<5x96xf32, #tpu.memory_space<vmem>>, vector<1x64xf32>
    %c0_28 = arith.constant 0 : index
    %c0_29 = arith.constant 0 : index
    %c0_30 = arith.constant 0 : index
    %57 = vector.load %arg5[%c0_28, %c0_29, %c0_30] : memref<2x32x96xbf16, #tpu.memory_space<vmem>>, vector<1x32x96xbf16>
    %58 = vector.shape_cast %57 : vector<1x32x96xbf16> to vector<32x96xbf16>
    %59 = arith.truncf %47 : vector<16x32xf32> to vector<16x32xbf16>
    %cst_31 = arith.constant dense<0.000000e+00> : vector<16x96xf32>
    %60 = tpu.matmul %59, %58, %cst_31 {dimension_numbers = #tpu.dot_dimension_numbers<[1], [0], [0], [1], [0, 0, 1, 1], [], []>} : vector<16x32xbf16>, vector<32x96xbf16>, vector<16x96xf32> -> vector<16x96xf32>
    %61 = vector.broadcast %55 : vector<1x96xf32> to vector<16x96xf32>
    %62 = arith.addf %60, %61 : vector<16x96xf32>
    %63 = vector.extract_strided_slice %62 {offsets = [0, 0], sizes = [16, 32], strides = [1, 1]} : vector<16x96xf32> to vector<16x32xf32>
    %cst_32 = arith.constant 2.500000e-01 : f32
    %64 = vector.broadcast %cst_32 : f32 to vector<16x32xf32>
    %65 = arith.mulf %63, %64 : vector<16x32xf32>
    %66 = vector.extract_strided_slice %62 {offsets = [0, 32], sizes = [16, 32], strides = [1, 1]} : vector<16x96xf32> to vector<16x32xf32>
    %67 = vector.extract_strided_slice %62 {offsets = [0, 64], sizes = [16, 32], strides = [1, 1]} : vector<16x96xf32> to vector<16x32xf32>
    %68 = vector.extract_strided_slice %65 {offsets = [0, 0], sizes = [16, 16], strides = [1, 1]} : vector<16x32xf32> to vector<16x16xf32>
    %69 = vector.extract_strided_slice %66 {offsets = [0, 0], sizes = [16, 16], strides = [1, 1]} : vector<16x32xf32> to vector<16x16xf32>
    %70 = arith.truncf %68 : vector<16x16xf32> to vector<16x16xbf16>
    %71 = arith.truncf %69 : vector<16x16xf32> to vector<16x16xbf16>
    %cst_33 = arith.constant dense<0.000000e+00> : vector<16x16xf32>
    %72 = tpu.matmul %70, %71, %cst_33 {dimension_numbers = #tpu.dot_dimension_numbers<[1], [1], [0], [0], [0, 0, 1, 0], [], []>} : vector<16x16xbf16>, vector<16x16xbf16>, vector<16x16xf32> -> vector<16x16xf32>
    %73 = arith.addf %72, %48 : vector<16x16xf32>
    %cst_34 = arith.constant dense<0xFF800000> : vector<16xf32>
    %74 = vector.multi_reduction <maximumf>, %73, %cst_34 [1] : vector<16x16xf32> to vector<16xf32>
    %75 = vector.shape_cast %74 : vector<16xf32> to vector<16x1xf32>
    %76 = vector.broadcast %75 : vector<16x1xf32> to vector<16x16xf32>
    %77 = arith.subf %73, %76 : vector<16x16xf32>
    %78 = math.exp %77 : vector<16x16xf32>
    %cst_35 = arith.constant dense<0.000000e+00> : vector<16xf32>
    %79 = vector.multi_reduction <add>, %78, %cst_35 [1] : vector<16x16xf32> to vector<16xf32>
    %80 = vector.shape_cast %79 : vector<16xf32> to vector<16x1xf32>
    %81 = tpu.reciprocal %80 {approx = true} : vector<16x1xf32> -> vector<16x1xf32>
    %82 = vector.broadcast %81 : vector<16x1xf32> to vector<16x16xf32>
    %83 = arith.mulf %78, %82 : vector<16x16xf32>
    %84 = vector.extract_strided_slice %67 {offsets = [0, 0], sizes = [16, 16], strides = [1, 1]} : vector<16x32xf32> to vector<16x16xf32>
    %85 = arith.truncf %83 : vector<16x16xf32> to vector<16x16xbf16>
    %86 = arith.truncf %84 : vector<16x16xf32> to vector<16x16xbf16>
    %cst_36 = arith.constant dense<0.000000e+00> : vector<16x16xf32>
    %87 = tpu.matmul %85, %86, %cst_36 {dimension_numbers = #tpu.dot_dimension_numbers<[1], [0], [0], [1], [0, 0, 1, 1], [], []>} : vector<16x16xbf16>, vector<16x16xbf16>, vector<16x16xf32> -> vector<16x16xf32>
    %88 = vector.extract_strided_slice %65 {offsets = [0, 16], sizes = [16, 16], strides = [1, 1]} : vector<16x32xf32> to vector<16x16xf32>
    %89 = vector.extract_strided_slice %66 {offsets = [0, 16], sizes = [16, 16], strides = [1, 1]} : vector<16x32xf32> to vector<16x16xf32>
    %90 = arith.truncf %88 : vector<16x16xf32> to vector<16x16xbf16>
    %91 = arith.truncf %89 : vector<16x16xf32> to vector<16x16xbf16>
    %cst_37 = arith.constant dense<0.000000e+00> : vector<16x16xf32>
    %92 = tpu.matmul %90, %91, %cst_37 {dimension_numbers = #tpu.dot_dimension_numbers<[1], [1], [0], [0], [0, 0, 1, 0], [], []>} : vector<16x16xbf16>, vector<16x16xbf16>, vector<16x16xf32> -> vector<16x16xf32>
    %93 = arith.addf %92, %48 : vector<16x16xf32>
    %cst_38 = arith.constant dense<0xFF800000> : vector<16xf32>
    %94 = vector.multi_reduction <maximumf>, %93, %cst_38 [1] : vector<16x16xf32> to vector<16xf32>
    %95 = vector.shape_cast %94 : vector<16xf32> to vector<16x1xf32>
    %96 = vector.broadcast %95 : vector<16x1xf32> to vector<16x16xf32>
    %97 = arith.subf %93, %96 : vector<16x16xf32>
    %98 = math.exp %97 : vector<16x16xf32>
    %cst_39 = arith.constant dense<0.000000e+00> : vector<16xf32>
    %99 = vector.multi_reduction <add>, %98, %cst_39 [1] : vector<16x16xf32> to vector<16xf32>
    %100 = vector.shape_cast %99 : vector<16xf32> to vector<16x1xf32>
    %101 = tpu.reciprocal %100 {approx = true} : vector<16x1xf32> -> vector<16x1xf32>
    %102 = vector.broadcast %101 : vector<16x1xf32> to vector<16x16xf32>
    %103 = arith.mulf %98, %102 : vector<16x16xf32>
    %104 = vector.extract_strided_slice %67 {offsets = [0, 16], sizes = [16, 16], strides = [1, 1]} : vector<16x32xf32> to vector<16x16xf32>
    %105 = arith.truncf %103 : vector<16x16xf32> to vector<16x16xbf16>
    %106 = arith.truncf %104 : vector<16x16xf32> to vector<16x16xbf16>
    %cst_40 = arith.constant dense<0.000000e+00> : vector<16x16xf32>
    %107 = tpu.matmul %105, %106, %cst_40 {dimension_numbers = #tpu.dot_dimension_numbers<[1], [0], [0], [1], [0, 0, 1, 1], [], []>} : vector<16x16xbf16>, vector<16x16xbf16>, vector<16x16xf32> -> vector<16x16xf32>
    %108 = tpu.concatenate %87, %107 in 1 : vector<16x16xf32>, vector<16x16xf32> -> vector<16x32xf32>
    %c0_41 = arith.constant 0 : index
    %c0_42 = arith.constant 0 : index
    %c0_43 = arith.constant 0 : index
    %109 = vector.load %arg6[%c0_41, %c0_42, %c0_43] : memref<2x32x32xbf16, #tpu.memory_space<vmem>>, vector<1x32x32xbf16>
    %110 = vector.shape_cast %109 : vector<1x32x32xbf16> to vector<32x32xbf16>
    %111 = arith.truncf %108 : vector<16x32xf32> to vector<16x32xbf16>
    %cst_44 = arith.constant dense<0.000000e+00> : vector<16x32xf32>
    %112 = tpu.matmul %111, %110, %cst_44 {dimension_numbers = #tpu.dot_dimension_numbers<[1], [0], [0], [1], [0, 0, 1, 1], [], []>} : vector<16x32xbf16>, vector<32x32xbf16>, vector<16x32xf32> -> vector<16x32xf32>
    %113 = vector.broadcast %53 : vector<1x32xf32> to vector<16x32xf32>
    %114 = arith.addf %112, %113 : vector<16x32xf32>
    %115 = arith.addf %114, %47 : vector<16x32xf32>
    %cst_45 = arith.constant dense<0.000000e+00> : vector<16xf32>
    %116 = vector.multi_reduction <add>, %115, %cst_45 [1] : vector<16x32xf32> to vector<16xf32>
    %117 = vector.shape_cast %116 : vector<16xf32> to vector<16x1xf32>
    %cst_46 = arith.constant 3.200000e+01 : f32
    %118 = vector.broadcast %cst_46 : f32 to vector<16x1xf32>
    %119 = arith.divf %117, %118 : vector<16x1xf32>
    %120 = vector.broadcast %119 : vector<16x1xf32> to vector<16x32xf32>
    %121 = arith.subf %115, %120 : vector<16x32xf32>
    %122 = vector.broadcast %119 : vector<16x1xf32> to vector<16x32xf32>
    %123 = arith.subf %115, %122 : vector<16x32xf32>
    %124 = arith.mulf %121, %123 : vector<16x32xf32>
    %cst_47 = arith.constant dense<0.000000e+00> : vector<16xf32>
    %125 = vector.multi_reduction <add>, %124, %cst_47 [1] : vector<16x32xf32> to vector<16xf32>
    %126 = vector.shape_cast %125 : vector<16xf32> to vector<16x1xf32>
    %cst_48 = arith.constant 3.200000e+01 : f32
    %127 = vector.broadcast %cst_48 : f32 to vector<16x1xf32>
    %128 = arith.divf %126, %127 : vector<16x1xf32>
    %129 = vector.broadcast %119 : vector<16x1xf32> to vector<16x32xf32>
    %130 = arith.subf %115, %129 : vector<16x32xf32>
    %cst_49 = arith.constant 9.99999996E-13 : f32
    %131 = vector.broadcast %cst_49 : f32 to vector<16x1xf32>
    %132 = arith.addf %128, %131 : vector<16x1xf32>
    %133 = math.rsqrt %132 : vector<16x1xf32>
    %134 = vector.broadcast %133 : vector<16x1xf32> to vector<16x32xf32>
    %135 = arith.mulf %130, %134 : vector<16x32xf32>
    %136 = vector.broadcast %49 : vector<1x32xf32> to vector<16x32xf32>
    %137 = arith.mulf %135, %136 : vector<16x32xf32>
    %138 = vector.broadcast %50 : vector<1x32xf32> to vector<16x32xf32>
    %139 = arith.addf %137, %138 : vector<16x32xf32>
    %c0_50 = arith.constant 0 : index
    %c0_51 = arith.constant 0 : index
    %c0_52 = arith.constant 0 : index
    %140 = vector.load %arg7[%c0_50, %c0_51, %c0_52] : memref<2x32x64xbf16, #tpu.memory_space<vmem>>, vector<1x32x64xbf16>
    %141 = vector.shape_cast %140 : vector<1x32x64xbf16> to vector<32x64xbf16>
    %142 = arith.truncf %139 : vector<16x32xf32> to vector<16x32xbf16>
    %cst_53 = arith.constant dense<0.000000e+00> : vector<16x64xf32>
    %143 = tpu.matmul %142, %141, %cst_53 {dimension_numbers = #tpu.dot_dimension_numbers<[1], [0], [0], [1], [0, 0, 1, 1], [], []>} : vector<16x32xbf16>, vector<32x64xbf16>, vector<16x64xf32> -> vector<16x64xf32>
    %144 = vector.broadcast %56 : vector<1x64xf32> to vector<16x64xf32>
    %145 = arith.addf %143, %144 : vector<16x64xf32>
    %cst_54 = arith.constant 5.000000e-01 : f32
    %146 = vector.broadcast %cst_54 : f32 to vector<16x64xf32>
    %147 = arith.mulf %146, %145 : vector<16x64xf32>
    %cst_55 = arith.constant 4.471500e-02 : f32
    %148 = vector.broadcast %cst_55 : f32 to vector<16x64xf32>
    %149 = arith.mulf %148, %145 : vector<16x64xf32>
    %150 = arith.mulf %149, %145 : vector<16x64xf32>
    %151 = arith.mulf %150, %145 : vector<16x64xf32>
    %152 = arith.addf %145, %151 : vector<16x64xf32>
    %cst_56 = arith.constant 0.797884583 : f32
    %153 = vector.broadcast %cst_56 : f32 to vector<16x64xf32>
    %154 = arith.mulf %153, %152 : vector<16x64xf32>
    %155 = math.tanh %154 : vector<16x64xf32>
    %cst_57 = arith.constant 1.000000e+00 : f32
    %156 = vector.broadcast %cst_57 : f32 to vector<16x64xf32>
    %157 = arith.addf %156, %155 : vector<16x64xf32>
    %158 = arith.mulf %147, %157 : vector<16x64xf32>
    %c0_58 = arith.constant 0 : index
    %c0_59 = arith.constant 0 : index
    %c0_60 = arith.constant 0 : index
    %159 = vector.load %arg8[%c0_58, %c0_59, %c0_60] : memref<2x64x32xbf16, #tpu.memory_space<vmem>>, vector<1x64x32xbf16>
    %160 = vector.shape_cast %159 : vector<1x64x32xbf16> to vector<64x32xbf16>
    %161 = arith.truncf %158 : vector<16x64xf32> to vector<16x64xbf16>
    %cst_61 = arith.constant dense<0.000000e+00> : vector<16x32xf32>
    %162 = tpu.matmul %161, %160, %cst_61 {dimension_numbers = #tpu.dot_dimension_numbers<[1], [0], [0], [1], [0, 0, 1, 1], [], []>} : vector<16x64xbf16>, vector<64x32xbf16>, vector<16x32xf32> -> vector<16x32xf32>
    %163 = vector.broadcast %54 : vector<1x32xf32> to vector<16x32xf32>
    %164 = arith.addf %162, %163 : vector<16x32xf32>
    %165 = arith.addf %164, %139 : vector<16x32xf32>
    %cst_62 = arith.constant dense<0.000000e+00> : vector<16xf32>
    %166 = vector.multi_reduction <add>, %165, %cst_62 [1] : vector<16x32xf32> to vector<16xf32>
    %167 = vector.shape_cast %166 : vector<16xf32> to vector<16x1xf32>
    %cst_63 = arith.constant 3.200000e+01 : f32
    %168 = vector.broadcast %cst_63 : f32 to vector<16x1xf32>
    %169 = arith.divf %167, %168 : vector<16x1xf32>
    %170 = vector.broadcast %169 : vector<16x1xf32> to vector<16x32xf32>
    %171 = arith.subf %165, %170 : vector<16x32xf32>
    %172 = vector.broadcast %169 : vector<16x1xf32> to vector<16x32xf32>
    %173 = arith.subf %165, %172 : vector<16x32xf32>
    %174 = arith.mulf %171, %173 : vector<16x32xf32>
    %cst_64 = arith.constant dense<0.000000e+00> : vector<16xf32>
    %175 = vector.multi_reduction <add>, %174, %cst_64 [1] : vector<16x32xf32> to vector<16xf32>
    %176 = vector.shape_cast %175 : vector<16xf32> to vector<16x1xf32>
    %cst_65 = arith.constant 3.200000e+01 : f32
    %177 = vector.broadcast %cst_65 : f32 to vector<16x1xf32>
    %178 = arith.divf %176, %177 : vector<16x1xf32>
    %179 = vector.broadcast %169 : vector<16x1xf32> to vector<16x32xf32>
    %180 = arith.subf %165, %179 : vector<16x32xf32>
    %cst_66 = arith.constant 9.99999996E-13 : f32
    %181 = vector.broadcast %cst_66 : f32 to vector<16x1xf32>
    %182 = arith.addf %178, %181 : vector<16x1xf32>
    %183 = math.rsqrt %182 : vector<16x1xf32>
    %184 = vector.broadcast %183 : vector<16x1xf32> to vector<16x32xf32>
    %185 = arith.mulf %180, %184 : vector<16x32xf32>
    %186 = vector.broadcast %51 : vector<1x32xf32> to vector<16x32xf32>
    %187 = arith.mulf %185, %186 : vector<16x32xf32>
    %188 = vector.broadcast %52 : vector<1x32xf32> to vector<16x32xf32>
    %189 = arith.addf %187, %188 : vector<16x32xf32>
    %c8 = arith.constant 8 : index
    %c0_67 = arith.constant 0 : index
    %190 = vector.load %arg3[%c8, %c0_67] : memref<15x32xf32, #tpu.memory_space<vmem>>, vector<1x32xf32>
    %c9 = arith.constant 9 : index
    %c0_68 = arith.constant 0 : index
    %191 = vector.load %arg3[%c9, %c0_68] : memref<15x32xf32, #tpu.memory_space<vmem>>, vector<1x32xf32>
    %c10 = arith.constant 10 : index
    %c0_69 = arith.constant 0 : index
    %192 = vector.load %arg3[%c10, %c0_69] : memref<15x32xf32, #tpu.memory_space<vmem>>, vector<1x32xf32>
    %c11 = arith.constant 11 : index
    %c0_70 = arith.constant 0 : index
    %193 = vector.load %arg3[%c11, %c0_70] : memref<15x32xf32, #tpu.memory_space<vmem>>, vector<1x32xf32>
    %c12 = arith.constant 12 : index
    %c0_71 = arith.constant 0 : index
    %194 = vector.load %arg3[%c12, %c0_71] : memref<15x32xf32, #tpu.memory_space<vmem>>, vector<1x32xf32>
    %c13 = arith.constant 13 : index
    %c0_72 = arith.constant 0 : index
    %195 = vector.load %arg3[%c13, %c0_72] : memref<15x32xf32, #tpu.memory_space<vmem>>, vector<1x32xf32>
    %c1_73 = arith.constant 1 : index
    %c0_74 = arith.constant 0 : index
    %196 = vector.load %arg4[%c1_73, %c0_74] : memref<5x96xf32, #tpu.memory_space<vmem>>, vector<1x96xf32>
    %c3_75 = arith.constant 3 : index
    %c0_76 = arith.constant 0 : index
    %197 = vector.load %arg4[%c3_75, %c0_76] : memref<5x96xf32, #tpu.memory_space<vmem>>, vector<1x64xf32>
    %c1_77 = arith.constant 1 : index
    %c0_78 = arith.constant 0 : index
    %c0_79 = arith.constant 0 : index
    %198 = vector.load %arg5[%c1_77, %c0_78, %c0_79] : memref<2x32x96xbf16, #tpu.memory_space<vmem>>, vector<1x32x96xbf16>
    %199 = vector.shape_cast %198 : vector<1x32x96xbf16> to vector<32x96xbf16>
    %200 = arith.truncf %189 : vector<16x32xf32> to vector<16x32xbf16>
    %cst_80 = arith.constant dense<0.000000e+00> : vector<16x96xf32>
    %201 = tpu.matmul %200, %199, %cst_80 {dimension_numbers = #tpu.dot_dimension_numbers<[1], [0], [0], [1], [0, 0, 1, 1], [], []>} : vector<16x32xbf16>, vector<32x96xbf16>, vector<16x96xf32> -> vector<16x96xf32>
    %202 = vector.broadcast %196 : vector<1x96xf32> to vector<16x96xf32>
    %203 = arith.addf %201, %202 : vector<16x96xf32>
    %204 = vector.extract_strided_slice %203 {offsets = [0, 0], sizes = [16, 32], strides = [1, 1]} : vector<16x96xf32> to vector<16x32xf32>
    %cst_81 = arith.constant 2.500000e-01 : f32
    %205 = vector.broadcast %cst_81 : f32 to vector<16x32xf32>
    %206 = arith.mulf %204, %205 : vector<16x32xf32>
    %207 = vector.extract_strided_slice %203 {offsets = [0, 32], sizes = [16, 32], strides = [1, 1]} : vector<16x96xf32> to vector<16x32xf32>
    %208 = vector.extract_strided_slice %203 {offsets = [0, 64], sizes = [16, 32], strides = [1, 1]} : vector<16x96xf32> to vector<16x32xf32>
    %209 = vector.extract_strided_slice %206 {offsets = [0, 0], sizes = [16, 16], strides = [1, 1]} : vector<16x32xf32> to vector<16x16xf32>
    %210 = vector.extract_strided_slice %207 {offsets = [0, 0], sizes = [16, 16], strides = [1, 1]} : vector<16x32xf32> to vector<16x16xf32>
    %211 = arith.truncf %209 : vector<16x16xf32> to vector<16x16xbf16>
    %212 = arith.truncf %210 : vector<16x16xf32> to vector<16x16xbf16>
    %cst_82 = arith.constant dense<0.000000e+00> : vector<16x16xf32>
    %213 = tpu.matmul %211, %212, %cst_82 {dimension_numbers = #tpu.dot_dimension_numbers<[1], [1], [0], [0], [0, 0, 1, 0], [], []>} : vector<16x16xbf16>, vector<16x16xbf16>, vector<16x16xf32> -> vector<16x16xf32>
    %214 = arith.addf %213, %48 : vector<16x16xf32>
    %cst_83 = arith.constant dense<0xFF800000> : vector<16xf32>
    %215 = vector.multi_reduction <maximumf>, %214, %cst_83 [1] : vector<16x16xf32> to vector<16xf32>
    %216 = vector.shape_cast %215 : vector<16xf32> to vector<16x1xf32>
    %217 = vector.broadcast %216 : vector<16x1xf32> to vector<16x16xf32>
    %218 = arith.subf %214, %217 : vector<16x16xf32>
    %219 = math.exp %218 : vector<16x16xf32>
    %cst_84 = arith.constant dense<0.000000e+00> : vector<16xf32>
    %220 = vector.multi_reduction <add>, %219, %cst_84 [1] : vector<16x16xf32> to vector<16xf32>
    %221 = vector.shape_cast %220 : vector<16xf32> to vector<16x1xf32>
    %222 = tpu.reciprocal %221 {approx = true} : vector<16x1xf32> -> vector<16x1xf32>
    %223 = vector.broadcast %222 : vector<16x1xf32> to vector<16x16xf32>
    %224 = arith.mulf %219, %223 : vector<16x16xf32>
    %225 = vector.extract_strided_slice %208 {offsets = [0, 0], sizes = [16, 16], strides = [1, 1]} : vector<16x32xf32> to vector<16x16xf32>
    %226 = arith.truncf %224 : vector<16x16xf32> to vector<16x16xbf16>
    %227 = arith.truncf %225 : vector<16x16xf32> to vector<16x16xbf16>
    %cst_85 = arith.constant dense<0.000000e+00> : vector<16x16xf32>
    %228 = tpu.matmul %226, %227, %cst_85 {dimension_numbers = #tpu.dot_dimension_numbers<[1], [0], [0], [1], [0, 0, 1, 1], [], []>} : vector<16x16xbf16>, vector<16x16xbf16>, vector<16x16xf32> -> vector<16x16xf32>
    %229 = vector.extract_strided_slice %206 {offsets = [0, 16], sizes = [16, 16], strides = [1, 1]} : vector<16x32xf32> to vector<16x16xf32>
    %230 = vector.extract_strided_slice %207 {offsets = [0, 16], sizes = [16, 16], strides = [1, 1]} : vector<16x32xf32> to vector<16x16xf32>
    %231 = arith.truncf %229 : vector<16x16xf32> to vector<16x16xbf16>
    %232 = arith.truncf %230 : vector<16x16xf32> to vector<16x16xbf16>
    %cst_86 = arith.constant dense<0.000000e+00> : vector<16x16xf32>
    %233 = tpu.matmul %231, %232, %cst_86 {dimension_numbers = #tpu.dot_dimension_numbers<[1], [1], [0], [0], [0, 0, 1, 0], [], []>} : vector<16x16xbf16>, vector<16x16xbf16>, vector<16x16xf32> -> vector<16x16xf32>
    %234 = arith.addf %233, %48 : vector<16x16xf32>
    %cst_87 = arith.constant dense<0xFF800000> : vector<16xf32>
    %235 = vector.multi_reduction <maximumf>, %234, %cst_87 [1] : vector<16x16xf32> to vector<16xf32>
    %236 = vector.shape_cast %235 : vector<16xf32> to vector<16x1xf32>
    %237 = vector.broadcast %236 : vector<16x1xf32> to vector<16x16xf32>
    %238 = arith.subf %234, %237 : vector<16x16xf32>
    %239 = math.exp %238 : vector<16x16xf32>
    %cst_88 = arith.constant dense<0.000000e+00> : vector<16xf32>
    %240 = vector.multi_reduction <add>, %239, %cst_88 [1] : vector<16x16xf32> to vector<16xf32>
    %241 = vector.shape_cast %240 : vector<16xf32> to vector<16x1xf32>
    %242 = tpu.reciprocal %241 {approx = true} : vector<16x1xf32> -> vector<16x1xf32>
    %243 = vector.broadcast %242 : vector<16x1xf32> to vector<16x16xf32>
    %244 = arith.mulf %239, %243 : vector<16x16xf32>
    %245 = vector.extract_strided_slice %208 {offsets = [0, 16], sizes = [16, 16], strides = [1, 1]} : vector<16x32xf32> to vector<16x16xf32>
    %246 = arith.truncf %244 : vector<16x16xf32> to vector<16x16xbf16>
    %247 = arith.truncf %245 : vector<16x16xf32> to vector<16x16xbf16>
    %cst_89 = arith.constant dense<0.000000e+00> : vector<16x16xf32>
    %248 = tpu.matmul %246, %247, %cst_89 {dimension_numbers = #tpu.dot_dimension_numbers<[1], [0], [0], [1], [0, 0, 1, 1], [], []>} : vector<16x16xbf16>, vector<16x16xbf16>, vector<16x16xf32> -> vector<16x16xf32>
    %249 = tpu.concatenate %228, %248 in 1 : vector<16x16xf32>, vector<16x16xf32> -> vector<16x32xf32>
    %c1_90 = arith.constant 1 : index
    %c0_91 = arith.constant 0 : index
    %c0_92 = arith.constant 0 : index
    %250 = vector.load %arg6[%c1_90, %c0_91, %c0_92] : memref<2x32x32xbf16, #tpu.memory_space<vmem>>, vector<1x32x32xbf16>
    %251 = vector.shape_cast %250 : vector<1x32x32xbf16> to vector<32x32xbf16>
    %252 = arith.truncf %249 : vector<16x32xf32> to vector<16x32xbf16>
    %cst_93 = arith.constant dense<0.000000e+00> : vector<16x32xf32>
    %253 = tpu.matmul %252, %251, %cst_93 {dimension_numbers = #tpu.dot_dimension_numbers<[1], [0], [0], [1], [0, 0, 1, 1], [], []>} : vector<16x32xbf16>, vector<32x32xbf16>, vector<16x32xf32> -> vector<16x32xf32>
    %254 = vector.broadcast %194 : vector<1x32xf32> to vector<16x32xf32>
    %255 = arith.addf %253, %254 : vector<16x32xf32>
    %256 = arith.addf %255, %189 : vector<16x32xf32>
    %cst_94 = arith.constant dense<0.000000e+00> : vector<16xf32>
    %257 = vector.multi_reduction <add>, %256, %cst_94 [1] : vector<16x32xf32> to vector<16xf32>
    %258 = vector.shape_cast %257 : vector<16xf32> to vector<16x1xf32>
    %cst_95 = arith.constant 3.200000e+01 : f32
    %259 = vector.broadcast %cst_95 : f32 to vector<16x1xf32>
    %260 = arith.divf %258, %259 : vector<16x1xf32>
    %261 = vector.broadcast %260 : vector<16x1xf32> to vector<16x32xf32>
    %262 = arith.subf %256, %261 : vector<16x32xf32>
    %263 = vector.broadcast %260 : vector<16x1xf32> to vector<16x32xf32>
    %264 = arith.subf %256, %263 : vector<16x32xf32>
    %265 = arith.mulf %262, %264 : vector<16x32xf32>
    %cst_96 = arith.constant dense<0.000000e+00> : vector<16xf32>
    %266 = vector.multi_reduction <add>, %265, %cst_96 [1] : vector<16x32xf32> to vector<16xf32>
    %267 = vector.shape_cast %266 : vector<16xf32> to vector<16x1xf32>
    %cst_97 = arith.constant 3.200000e+01 : f32
    %268 = vector.broadcast %cst_97 : f32 to vector<16x1xf32>
    %269 = arith.divf %267, %268 : vector<16x1xf32>
    %270 = vector.broadcast %260 : vector<16x1xf32> to vector<16x32xf32>
    %271 = arith.subf %256, %270 : vector<16x32xf32>
    %cst_98 = arith.constant 9.99999996E-13 : f32
    %272 = vector.broadcast %cst_98 : f32 to vector<16x1xf32>
    %273 = arith.addf %269, %272 : vector<16x1xf32>
    %274 = math.rsqrt %273 : vector<16x1xf32>
    %275 = vector.broadcast %274 : vector<16x1xf32> to vector<16x32xf32>
    %276 = arith.mulf %271, %275 : vector<16x32xf32>
    %277 = vector.broadcast %190 : vector<1x32xf32> to vector<16x32xf32>
    %278 = arith.mulf %276, %277 : vector<16x32xf32>
    %279 = vector.broadcast %191 : vector<1x32xf32> to vector<16x32xf32>
    %280 = arith.addf %278, %279 : vector<16x32xf32>
    %c1_99 = arith.constant 1 : index
    %c0_100 = arith.constant 0 : index
    %c0_101 = arith.constant 0 : index
    %281 = vector.load %arg7[%c1_99, %c0_100, %c0_101] : memref<2x32x64xbf16, #tpu.memory_space<vmem>>, vector<1x32x64xbf16>
    %282 = vector.shape_cast %281 : vector<1x32x64xbf16> to vector<32x64xbf16>
    %283 = arith.truncf %280 : vector<16x32xf32> to vector<16x32xbf16>
    %cst_102 = arith.constant dense<0.000000e+00> : vector<16x64xf32>
    %284 = tpu.matmul %283, %282, %cst_102 {dimension_numbers = #tpu.dot_dimension_numbers<[1], [0], [0], [1], [0, 0, 1, 1], [], []>} : vector<16x32xbf16>, vector<32x64xbf16>, vector<16x64xf32> -> vector<16x64xf32>
    %285 = vector.broadcast %197 : vector<1x64xf32> to vector<16x64xf32>
    %286 = arith.addf %284, %285 : vector<16x64xf32>
    %cst_103 = arith.constant 5.000000e-01 : f32
    %287 = vector.broadcast %cst_103 : f32 to vector<16x64xf32>
    %288 = arith.mulf %287, %286 : vector<16x64xf32>
    %cst_104 = arith.constant 4.471500e-02 : f32
    %289 = vector.broadcast %cst_104 : f32 to vector<16x64xf32>
    %290 = arith.mulf %289, %286 : vector<16x64xf32>
    %291 = arith.mulf %290, %286 : vector<16x64xf32>
    %292 = arith.mulf %291, %286 : vector<16x64xf32>
    %293 = arith.addf %286, %292 : vector<16x64xf32>
    %cst_105 = arith.constant 0.797884583 : f32
    %294 = vector.broadcast %cst_105 : f32 to vector<16x64xf32>
    %295 = arith.mulf %294, %293 : vector<16x64xf32>
    %296 = math.tanh %295 : vector<16x64xf32>
    %cst_106 = arith.constant 1.000000e+00 : f32
    %297 = vector.broadcast %cst_106 : f32 to vector<16x64xf32>
    %298 = arith.addf %297, %296 : vector<16x64xf32>
    %299 = arith.mulf %288, %298 : vector<16x64xf32>
    %c1_107 = arith.constant 1 : index
    %c0_108 = arith.constant 0 : index
    %c0_109 = arith.constant 0 : index
    %300 = vector.load %arg8[%c1_107, %c0_108, %c0_109] : memref<2x64x32xbf16, #tpu.memory_space<vmem>>, vector<1x64x32xbf16>
    %301 = vector.shape_cast %300 : vector<1x64x32xbf16> to vector<64x32xbf16>
    %302 = arith.truncf %299 : vector<16x64xf32> to vector<16x64xbf16>
    %cst_110 = arith.constant dense<0.000000e+00> : vector<16x32xf32>
    %303 = tpu.matmul %302, %301, %cst_110 {dimension_numbers = #tpu.dot_dimension_numbers<[1], [0], [0], [1], [0, 0, 1, 1], [], []>} : vector<16x64xbf16>, vector<64x32xbf16>, vector<16x32xf32> -> vector<16x32xf32>
    %304 = vector.broadcast %195 : vector<1x32xf32> to vector<16x32xf32>
    %305 = arith.addf %303, %304 : vector<16x32xf32>
    %306 = arith.addf %305, %280 : vector<16x32xf32>
    %cst_111 = arith.constant dense<0.000000e+00> : vector<16xf32>
    %307 = vector.multi_reduction <add>, %306, %cst_111 [1] : vector<16x32xf32> to vector<16xf32>
    %308 = vector.shape_cast %307 : vector<16xf32> to vector<16x1xf32>
    %cst_112 = arith.constant 3.200000e+01 : f32
    %309 = vector.broadcast %cst_112 : f32 to vector<16x1xf32>
    %310 = arith.divf %308, %309 : vector<16x1xf32>
    %311 = vector.broadcast %310 : vector<16x1xf32> to vector<16x32xf32>
    %312 = arith.subf %306, %311 : vector<16x32xf32>
    %313 = vector.broadcast %310 : vector<16x1xf32> to vector<16x32xf32>
    %314 = arith.subf %306, %313 : vector<16x32xf32>
    %315 = arith.mulf %312, %314 : vector<16x32xf32>
    %cst_113 = arith.constant dense<0.000000e+00> : vector<16xf32>
    %316 = vector.multi_reduction <add>, %315, %cst_113 [1] : vector<16x32xf32> to vector<16xf32>
    %317 = vector.shape_cast %316 : vector<16xf32> to vector<16x1xf32>
    %cst_114 = arith.constant 3.200000e+01 : f32
    %318 = vector.broadcast %cst_114 : f32 to vector<16x1xf32>
    %319 = arith.divf %317, %318 : vector<16x1xf32>
    %320 = vector.broadcast %310 : vector<16x1xf32> to vector<16x32xf32>
    %321 = arith.subf %306, %320 : vector<16x32xf32>
    %cst_115 = arith.constant 9.99999996E-13 : f32
    %322 = vector.broadcast %cst_115 : f32 to vector<16x1xf32>
    %323 = arith.addf %319, %322 : vector<16x1xf32>
    %324 = math.rsqrt %323 : vector<16x1xf32>
    %325 = vector.broadcast %324 : vector<16x1xf32> to vector<16x32xf32>
    %326 = arith.mulf %321, %325 : vector<16x32xf32>
    %327 = vector.broadcast %192 : vector<1x32xf32> to vector<16x32xf32>
    %328 = arith.mulf %326, %327 : vector<16x32xf32>
    %329 = vector.broadcast %193 : vector<1x32xf32> to vector<16x32xf32>
    %330 = arith.addf %328, %329 : vector<16x32xf32>
    %c14 = arith.constant 14 : index
    %c0_116 = arith.constant 0 : index
    %331 = vector.load %arg3[%c14, %c0_116] : memref<15x32xf32, #tpu.memory_space<vmem>>, vector<1x32xf32>
    %c4_117 = arith.constant 4 : index
    %c0_118 = arith.constant 0 : index
    %332 = vector.load %arg4[%c4_117, %c0_118] : memref<5x96xf32, #tpu.memory_space<vmem>>, vector<1x3xf32>
    %c0_119 = arith.constant 0 : index
    %c0_120 = arith.constant 0 : index
    %333 = vector.load %arg9[%c0_119, %c0_120] : memref<32x35xf32, #tpu.memory_space<vmem>>, vector<32x32xf32>
    %c0_121 = arith.constant 0 : index
    %c32 = arith.constant 32 : index
    %334 = vector.load %arg9[%c0_121, %c32] : memref<32x35xf32, #tpu.memory_space<vmem>>, vector<32x3xf32>
    %335 = vector.extract_strided_slice %330 {offsets = [0, 0], sizes = [1, 32], strides = [1, 1]} : vector<16x32xf32> to vector<1x32xf32>
    %336 = vector.extract_strided_slice %330 {offsets = [8, 0], sizes = [1, 32], strides = [1, 1]} : vector<16x32xf32> to vector<1x32xf32>
    %337 = tpu.concatenate %335, %336 in 0 : vector<1x32xf32>, vector<1x32xf32> -> vector<2x32xf32>
    %cst_122 = arith.constant dense<0.000000e+00> : vector<2x32xf32>
    %338 = tpu.matmul %337, %333, %cst_122 {dimension_numbers = #tpu.dot_dimension_numbers<[1], [0], [0], [1], [0, 0, 1, 1], [], []>} : vector<2x32xf32>, vector<32x32xf32>, vector<2x32xf32> -> vector<2x32xf32>
    %339 = vector.broadcast %331 : vector<1x32xf32> to vector<2x32xf32>
    %340 = arith.addf %338, %339 : vector<2x32xf32>
    %341 = math.tanh %340 : vector<2x32xf32>
    %cst_123 = arith.constant dense<0.000000e+00> : vector<2x3xf32>
    %342 = tpu.matmul %341, %334, %cst_123 {dimension_numbers = #tpu.dot_dimension_numbers<[1], [0], [0], [1], [0, 0, 1, 1], [], []>} : vector<2x32xf32>, vector<32x3xf32>, vector<2x3xf32> -> vector<2x3xf32>
    %343 = vector.broadcast %332 : vector<1x3xf32> to vector<2x3xf32>
    %344 = arith.addf %342, %343 : vector<2x3xf32>
    %c0_124 = arith.constant 0 : index
    %c2_125 = arith.constant 2 : index
    %345 = vector.load %arg0[%c0_124, %c2_125] : memref<16x4xi32, #tpu.memory_space<vmem>>, vector<2x1xi32>
    %346 = tpu.iota {dimensions = array<i32: 1>} : vector<2x3xi32>
    %347 = vector.broadcast %345 : vector<2x1xi32> to vector<2x3xi32>
    %348 = arith.cmpi eq, %346, %347 : vector<2x3xi32>
    %349 = arith.extui %348 : vector<2x3xi1> to vector<2x3xi32>
    %350 = arith.sitofp %349 : vector<2x3xi32> to vector<2x3xf32>
    %cst_126 = arith.constant dense<0xFF800000> : vector<2xf32>
    %351 = vector.multi_reduction <maximumf>, %344, %cst_126 [1] : vector<2x3xf32> to vector<2xf32>
    %352 = vector.shape_cast %351 : vector<2xf32> to vector<2x1xf32>
    %353 = vector.broadcast %352 : vector<2x1xf32> to vector<2x3xf32>
    %354 = arith.subf %344, %353 : vector<2x3xf32>
    %355 = math.exp %354 : vector<2x3xf32>
    %cst_127 = arith.constant dense<0.000000e+00> : vector<2xf32>
    %356 = vector.multi_reduction <add>, %355, %cst_127 [1] : vector<2x3xf32> to vector<2xf32>
    %357 = vector.shape_cast %356 : vector<2xf32> to vector<2x1xf32>
    %358 = math.log %357 : vector<2x1xf32>
    %359 = arith.addf %358, %352 : vector<2x1xf32>
    %360 = arith.mulf %350, %344 : vector<2x3xf32>
    %cst_128 = arith.constant dense<0.000000e+00> : vector<2xf32>
    %361 = vector.multi_reduction <add>, %360, %cst_128 [1] : vector<2x3xf32> to vector<2xf32>
    %362 = vector.shape_cast %361 : vector<2xf32> to vector<2x1xf32>
    %363 = arith.subf %359, %362 : vector<2x1xf32>
    %364 = vector.shape_cast %363 : vector<2x1xf32> to vector<1x2x1xf32>
    %cst_129 = arith.constant dense<0.000000e+00> : vector<1xf32>
    %365 = vector.multi_reduction <add>, %364, %cst_129 [1, 2] : vector<1x2x1xf32> to vector<1xf32>
    %366 = vector.shape_cast %365 : vector<1xf32> to vector<1x1x1xf32>
    %367 = vector.extract %366[0, 0, 0] : f32 from vector<1x1x1xf32>
    %368 = vector.broadcast %367 : f32 to vector<1x1xf32>
    %cst_130 = arith.constant 2.000000e+00 : f32
    %369 = vector.broadcast %cst_130 : f32 to vector<1x1xf32>
    %370 = arith.divf %368, %369 : vector<1x1xf32>
    %c0_131 = arith.constant 0 : index
    %c0_132 = arith.constant 0 : index
    %371 = vector.load %arg10[%c0_131, %c0_132] : memref<1x1xf32, #tpu.memory_space<vmem>>, vector<1x1xf32>
    tpu.vector_store %arg10[%c0_131, %c0_132], %370 {strides = array<i32>} : memref<1x1xf32, #tpu.memory_space<vmem>>, vector<1x1xf32>,
    %cst_133 = arith.constant dense<0xFF800000> : vector<3xf32>
    %372 = vector.multi_reduction <maximumf>, %344, %cst_133 [0] : vector<2x3xf32> to vector<3xf32>
    %373 = vector.shape_cast %372 : vector<3xf32> to vector<1x3xf32>
    %374 = vector.broadcast %373 : vector<1x3xf32> to vector<2x3xf32>
    %375 = arith.subf %344, %374 : vector<2x3xf32>
    %376 = math.exp %375 : vector<2x3xf32>
    %cst_134 = arith.constant dense<0.000000e+00> : vector<3xf32>
    %377 = vector.multi_reduction <add>, %376, %cst_134 [0] : vector<2x3xf32> to vector<3xf32>
    %378 = vector.shape_cast %377 : vector<3xf32> to vector<1x3xf32>
    %379 = vector.broadcast %378 : vector<1x3xf32> to vector<2x3xf32>
    %380 = arith.divf %376, %379 : vector<2x3xf32>
    %c0_135 = arith.constant 0 : index
    %c0_136 = arith.constant 0 : index
    %381 = vector.load %arg11[%c0_135, %c0_136] : memref<2x3xf32, #tpu.memory_space<vmem>>, vector<2x3xf32>
    tpu.vector_store %arg11[%c0_135, %c0_136], %380 {strides = array<i32>} : memref<2x3xf32, #tpu.memory_space<vmem>>, vector<2x3xf32>,
    return
  }
}

</mosaic_0001>

<bundles_post_ra>
// kernel: document_level_bert_forward.1
= control target key start
LH: loop header
LB: loop body
LE: loop exit
PB: predicated region body
PF: predicated region fallthrough
CT: control target
= control target key end

     0   :  { %17 = vsyncpa [#allocation3], 0  ;;  %v2318_v2 = vmov 0   ;;  %v2319_v11 = vmov 0.0   ;;  %v2320_v17 = vmov 1   ;;  %s2804_s0 = inlined_call_operand.vmem [shape: s32[16,4], index: 0, kind: input, shape index: {}]   ;;  %s2805_s1 = inlined_call_operand.vmem [shape: f32[16,16], index: 1, kind: input, shape index: {}]   ;;  %s2806_s2 = inlined_call_operand.vmem [shape: f32[124,32], index: 2, kind: input, shape index: {}]   ;;  %s2807_s3 = inlined_call_operand.vmem [shape: f32[15,32], index: 3, kind: input, shape index: {}]   ;;  %s2808_s4 = inlined_call_operand.vmem [shape: f32[5,96], index: 4, kind: input, shape index: {}]   ;;  %s2809_s5 = inlined_call_operand.vmem [shape: bf16[2,32,96], index: 5, kind: input, shape index: {}]   ;;  %s2810_s6 = inlined_call_operand.vmem [shape: bf16[2,32,32], index: 6, kind: input, shape index: {}]   ;;  %s2811_s7 = inlined_call_operand.vmem [shape: bf16[2,32,64], index: 7, kind: input, shape index: {}]   ;;  %s2812_s8 = inlined_call_operand.vmem [shape: bf16[2,64,32], index: 8, kind: input, shape index: {}]   ;;  %s2813_s9 = inlined_call_operand.vmem [shape: f32[32,35], index: 9, kind: input, shape index: {}]   ;;  %s2814_s10 = inlined_call_operand.hbm [shape: f32[1,1], index: 10, kind: output, shape index: {0}]   ;;  %s2815_s11 = inlined_call_operand.hbm [shape: f32[2,3], index: 11, kind: output, shape index: {1}]  }
   0x1   :  { %v40_v0 = vld [vmem:[%s2804_s0] sm:$0xff]  ;;  %v56_v1 = vld [vmem:[%s2806_s2 + $0x18] sm:$0xff]  ;;  %2157 = vset.pattern.permute.xlu0 %v2318_v2  ;;  %v58_v4 = vld [vmem:[%s2806_s2 + $0x28] sm:$0xff]  ;;  %1963 = vmatprep.subr.bf16.mxu1 %v2319_v11 }
   0x2   :  { %v57_v3 = vld [vmem:[%s2806_s2 + $0x20] sm:$0xff]  ;;  %v59_v5 = vld [vmem:[%s2806_s2 + $0x30] sm:$0xff]  ;;  %45 = vperm.xlu0 %2157, %v40_v0   ;;  %v41_v8 = vld [vmem:[%s2804_s0 + $0x8] sm:$0xff]  ;;  %v158_v15 = vcvt.s32.f32 %v40_v0  ;;  %2158 = vset.pattern.permute.xlu1 %v2320_v17 }
   0x3   :  { %v2105_v6 = vpack.c.bf16 %v57_v3, %v56_v1  ;;  %v2109_v7 = vpack.c.bf16 %v59_v5, %v58_v4  ;;  %v60_v9 = vld [vmem:[%s2806_s2 + $0x38] sm:$0xff]  ;;  %v61_v10 = vld [vmem:[%s2806_s2 + $0x40] sm:$0xff]  ;;  %v62_v12 = vld [vmem:[%s2806_s2 + $0x48] sm:$0xff]  ;;  %v159_v18 = vcvt.s32.f32 %v41_v8 }
   0x4   :  { %v63_v13 = vld [vmem:[%s2806_s2 + $0x50] sm:$0xff]  ;;  %v2113_v14 = vpack.c.bf16 %v61_v10, %v60_v9  ;;  %v64_v16 = vld [vmem:[%s2806_s2 + $0x58] sm:$0xff]  ;;  %v65_v20 = vld [vmem:[%s2806_s2 + $0x60] sm:$0xff]  ;;  %169 = vperm.xlu1 %2158, %v158_v15  }
   0x5   :  { %2106 = vmatprep.subr.bf16.mxu0 %v2105_v6  ;;  %v2117_v19 = vpack.c.bf16 %v63_v13, %v62_v12  ;;  %v66_v21 = vld [vmem:[%s2806_s2 + $0x68] sm:$0xff]  ;;  %v67_v22 = vld [vmem:[%s2806_s2 + $0x70] sm:$0xff]  ;;  %v2121_v23 = vpack.c.bf16 %v65_v20, %v64_v16 }
   0x6   :  { %2108 = vmatpush3.bf16.msra.mxu0 %v2105_v6  ;;  %48 = vperm.xlu0 %2157, %v41_v8   ;;  %v2125_v24 = vpack.c.bf16 %v67_v22, %v66_v21 }
   0x7   :  { %2110 = vmatprep.subr.bf16.mxu0 %v2109_v7 }
   0x8   :  { %174 = vperm.xlu1 %2158, %v159_v18  }
   0xa   :  { %2112 = vmatpush3.bf16.msra.mxu0 %v2109_v7 }
   0xb   :  { %2114 = vmatprep.subr.bf16.mxu0 %v2113_v14 }
   0xe   :  { %2116 = vmatpush3.bf16.msra.mxu0 %v2113_v14 }
   0xf   :  { %2118 = vmatprep.subr.bf16.mxu0 %v2117_v19 }
  0x12   :  { %2120 = vmatpush3.bf16.msra.mxu0 %v2117_v19 }
  0x13   :  { %2122 = vmatprep.subr.bf16.mxu0 %v2121_v23 }
  0x14   :  { %18 = vsyncpa [#allocation5], 0  ;;  %v68_v25 = vld [vmem:[%s2806_s2 + $0x78] sm:$0xf]  ;;  %vm77_vm0 = vcmask 1043456   ;;  %v42_v26 = vlaneseq  ;;  %vm70_vm1 = vcmask 818176  }
  0x15   :  { %v156_v33 = vld [vmem:[%s2806_s2 + $0x10] sm:$0x1]  ;;  %v157_v34 = vld [vmem:[%s2806_s2 + $0x11] sm:$0x1]  ;;  %v69_v39 = vld [vmem:[%s2806_s2] sm:$0xff]  ;;  %vm187_vm4 = vcmask 261120  }
  0x16   :  { %2124 = vmatpush3.bf16.msra.mxu0 %v2121_v23  ;;  %v2439_v27 = vand.u32 127, %v42_v26  ;;  %v161_v32 = vshrl.u32 %v42_v26, 7  ;;  %v166_v37 = vsub.f32 %v157_v34, %v156_v33  ;;  %v2180_v0 = vld [vmem:[%s2809_s5] sm:$0xff]   ;;  %v2181_v1 = vld [vmem:[%s2809_s5 + $0x8] sm:$0xff]   ;;  %vm2321_vm5 = vmmov 0   ;;  %s2322_s24 = smov 96  }
  0x17   :  { %2126 = vmatprep.subr.bf16.mxu0 %v2125_v24  ;;  %1964 = vmatpush3.bf16.msra.mxu1 %v2180_v0  ;;  %v1786_v10 = vld [vmem:[%s2807_s3] ss:$0 sm:$0xff]  ;;  %v1787_v15 = vld [vmem:[%s2807_s3 + $0x1] ss:$0 sm:$0xff]  ;;  %s2323_s25 = smov 64   ;;  %s2324_s26 = smov 112  }
  0x18   :  { %v162_v36 = vsub.s32 0, %v161_v32  ;;  %1967 = vmatprep.mubr.msk.bf16.mxu1 %vm2321_vm5, %v2319_v11  ;;  %1965 = vmatprep.subr.bf16.mxu1 %v2319_v11  ;;  %v1788_v20 = vld [vmem:[%s2808_s4] ss:$0 sm:$0xff]  ;;  %vm309_vm6 = vcmask 130048   ;;  %s2326_s12 = smov 48   ;;  %s2327_s16 = smov 16  }
  0x19   :  { %vm784_vm7 = vcmask 523264   ;;  %vm1520_vm8 = vcmask 1040384   ;;  %vm1700_vm10 = vcmask 17408   ;;  %vm1718_vm11 = vcmask 1024  }
  0x1a   :  { %2128 = vmatpush3.bf16.msra.mxu0 %v2125_v24  ;;  %v180_v38 = vrot.slane %v166_v37, %v162_v36  ;;  %v163_v41 = vrot.slane %v156_v33, %v162_v36  ;;  %v2509_v37 = vld [vmem:[%s2805_s1 + $0x8] sm:$0xff] }
  0x1b   :  { %1958 = vmatprep.subr.msk.mxu0 %vm77_vm0, %v68_v25  ;;  %1966 = vmatpush3.bf16.msra.mxu1 %v2181_v1 }
  0x1c   :  { %1971 = vmatprep.subr.bf16.mxu1 %v2319_v11 }
  0x1e   :  { %1959 = vmatpush3.msk.msra.mxu0 %vm77_vm0, %v68_v25 }
  0x1f   :  { %1989 = vmatprep.subr.bf16.mxu0 %v2319_v11 }
  0x81   :  { %v46_v28 = vpop.permute.xlu0 %45 }
  0x82   :  { %vm50_vm2 = vcmp.eq.s32.totalorder %v2439_v27, %v46_v28 }
  0x83   :  { %v1781_v29 = vsel %vm50_vm2, 1.0, %v2319_v11  ;;  %v170_v35 = vpop.permute.xlu1 %169 }
  0x84   :  { %1960 = vmatprep.mubr.msk.f32.mxu0 %vm70_vm1, %v1781_v29  ;;  %v181_v46 = vmul.f32 %v180_v38, %v170_v35  ;;  %v2504_v35 = vld [vmem:[%s2805_s1] sm:$0xff]  ;;  %s2325_s1 = smov 80  }
  0x85   :  { %v49_v30 = vpop.permute.xlu0 %48 }
  0x86   :  { %vm51_vm3 = vcmp.eq.s32.totalorder %v2439_v27, %v49_v30 }
  0x87   :  { %v1782_v31 = vsel %vm51_vm3, 1.0, %v2319_v11  ;;  %v175_v40 = vpop.permute.xlu1 %174 }
  0x88   :  { %1961 = vmatmul.mubr.msk.f32.vlgmr.msra.gmra.mrb[0].mxu0 %vm70_vm1, %v1782_v31  ;;  %v182_v45 = vmul.f32 %v180_v38, %v175_v40 }
  0x89   :  { %1991 = vmatprep.mubr.msk.bf16.mxu0 %vm2321_vm5, %v2319_v11 }
 0x15b   :  { %v1962_v42 = vpop.f32.mrb[0].mxu0 }
 0x15c   :  { %v153_v43 = vadd.f32 %v1962_v42, %v69_v39  ;;  %v147_v44 = vpop.f32.mrb[1].mxu0 }
 0x15d   :  { %v148_v47 = vadd.f32 %v147_v44, %v69_v39 }
 0x15e   :  { %v165_v48 = vadd.f32 %v163_v41, %v153_v43 }
 0x15f   :  { %v164_v49 = vadd.f32 %v163_v41, %v148_v47 }
 0x160   :  { %v184_v50 = vadd.f32 %v182_v45, %v165_v48 }
 0x161   :  { %v183_v51 = vadd.f32 %v181_v46, %v164_v49 }
 0x162   :  { %v191_v52 = vsel %vm187_vm4, %v184_v50, 0.0 }
 0x163   :  { %192 = vadd.xlane.f32.xlu1 %v191_v52  ;;  %v188_v53 = vsel %vm187_vm4, %v183_v51, 0.0 }
 0x164   :  { %189 = vadd.xlane.f32.xlu0 %v188_v53 }
 0x1f0   :  { %v193_v54 = vpop.xlane.xlu1 %192 }
 0x1f1   :  { %v196_v55 = vmul.f32 0.03125, %v193_v54  ;;  %v190_v56 = vpop.xlane.xlu0 %189 }
 0x1f2   :  { %v195_v57 = vmul.f32 0.03125, %v190_v56 }
 0x1f3   :  { %v198_v58 = vsub.f32 %v184_v50, %v196_v55 }
 0x1f4   :  { %v197_v59 = vsub.f32 %v183_v51, %v195_v57 }
 0x1f5   :  { %v200_v62 = vmul.f32 %v198_v58, %v198_v58 }
 0x1f6   :  { %v199_v60 = vmul.f32 %v197_v59, %v197_v59 }
 0x1f7   :  { %v204_v63 = vsel %vm187_vm4, %v200_v62, 0.0 }
 0x1f8   :  { %v201_v61 = vsel %vm187_vm4, %v199_v60, 0.0 }
 0x1f9   :  { %202 = vadd.xlane.f32.xlu0 %v201_v61 }
 0x1fd   :  { %205 = vadd.xlane.f32.xlu0 %v204_v63 }
 0x286   :  { %v203_v2 = vpop.xlane.xlu0 %202 }
 0x287   :  { %v207_v3 = vmul.f32 0.03125, %v203_v2 }
 0x289   :  { %v209_v4 = vadd.f32 1e-12, %v207_v3 }
 0x28a   :  { %v206_v5 = vpop.xlane.xlu0 %205 }
 0x28b   :  { %2200 = vrsqrt.f32 %v209_v4  ;;  %v208_v6 = vmul.f32 0.03125, %v206_v5 }
 0x28d   :  { %v210_v7 = vadd.f32 1e-12, %v208_v6 }
 0x28f   :  { %2202 = vrsqrt.f32 %v210_v7 }
 0x295   :  { %v2201_v8 = vpop.eup %2200 }
 0x296   :  { %v213_v9 = vmul.f32 %v2201_v8, %v197_v59 }
 0x298   :  { %v219_v14 = vmul.f32 %v1786_v10, %v213_v9 }
 0x299   :  { %v2203_v12 = vpop.eup %2202 }
 0x29a   :  { %v214_v13 = vmul.f32 %v2203_v12, %v198_v58  ;;  %v2476_v17 = vadd.f32 %v1787_v15, %v219_v14 }
 0x29c   :  { %v220_v16 = vmul.f32 %v1786_v10, %v214_v13 }
 0x29e   :  { %v2478_v18 = vadd.f32 %v1787_v15, %v220_v16 }
 0x2a0   :  { %v241_v19 = vpack.c.bf16 %v2478_v18, %v2476_v17 }
 0x2a2   :  { %1968 = vmatmul.mubr.msk.bf16.vlgmr.msra.gmra.mrb[0].mxu1 %vm187_vm4, %v241_v19 }
 0x2a3   :  { %1973 = vmatprep.mubr.msk.bf16.mxu1 %vm2321_vm5, %v2319_v11 }
 0x375   :  { %v295_v21 = vpop.f32.mrb[0].mxu1 }
 0x376   :  { %v296_v22 = vadd.f32 %v1788_v20, %v295_v21  ;;  %v1969_v23 = vpop.f32.mrb[1].mxu1 }
 0x377   :  { %v298_v24 = vpop.f32.mrb[2].mxu1 }
 0x378   :  { %v299_v25 = vadd.f32 %v1788_v20, %v298_v24  ;;  %v1970_v26 = vpop.f32.mrb[3].mxu1  ;;  %v302_v28 = vmul.f32 0.25, %v296_v22 }
 0x37a   :  { %v303_v29 = vmul.f32 0.25, %v299_v25  ;;  %v2488_v30 = vpack.c.bf16 %v299_v25, %v296_v22 }
 0x37c   :  { %307 = vrot.lane.b32.xlu1 %v2488_v30, %s2322_s24  ;;  %v304_v31 = vpack.c.bf16 %v303_v29, %v302_v28 }
 0x380   :  { %380 = vrot.lane.b32.xlu1 %v2488_v30, %s2323_s25 }
 0x384   :  { %428 = vrot.lane.b32.xlu1 %v304_v31, %s2324_s26 }
 0x3ee   :  { %v308_v32 = vpop.permute.xlu1 %307 }
 0x3ef   :  { %v314_v33 = vsel %vm309_vm6, %v308_v32, 0 }
 0x3f0   :  { %1972 = vmatpush3.bf16.xpose.msra.mxu1 %v314_v33 }
 0x3f1   :  { %1977 = vmatprep.subr.bf16.mxu1 %v2319_v11 }
 0x3f2   :  { %v381_v34 = vpop.permute.xlu1 %380 }
 0x3f6   :  { %v429_v0 = vpop.permute.xlu1 %428 }
 0x3f7   :  { %1974 = vmatmul.mubr.msk.bf16.vlgmr.msra.gmra.mrb[4].mxu1 %vm309_vm6, %v304_v31 }
 0x3f8   :  { %1978 = vmatpush3.bf16.msra.mxu1 %v381_v34  ;;  %1979 = vmatprep.mubr.msk.bf16.mxu1 %vm2321_vm5, %v2319_v11 }
 0x3f9   :  { %1983 = vmatprep.subr.bf16.mxu1 %v2319_v11 }
 0x4ca   :  { %v350_v36 = vpop.f32.mrb[4].mxu1 }
 0x4cb   :  { %v351_v38 = vadd.f32 %v350_v36, %v2504_v35  ;;  %v1975_v39 = vpop.f32.mrb[5].mxu1 }
 0x4cc   :  { %v353_v40 = vpop.f32.mrb[6].mxu1 }
 0x4cd   :  { %v354_v41 = vadd.f32 %v353_v40, %v2509_v37  ;;  %v1976_v42 = vpop.f32.mrb[7].mxu1  ;;  %v357_v43 = vsel %vm309_vm6, %v351_v38, -inf }
 0x4ce   :  { %358 = vmax.xlane.f32.xlu0 %v357_v43 }
 0x4cf   :  { %v360_v44 = vsel %vm309_vm6, %v354_v41, -inf }
 0x4d2   :  { %361 = vmax.xlane.f32.xlu0 %v360_v44 }
 0x55b   :  { %v359_v45 = vpop.xlane.xlu0 %358 }
 0x55c   :  { %v363_v46 = vsub.f32 %v351_v38, %v359_v45  ;;  %v2183_v38 = vld [vmem:[%s2810_s6 + $0x8] sm:$0xff]  }
 0x55e   :  { %v365_v47 = vmul.f32 1.442695, %v363_v46 }
 0x55f   :  { %v362_v48 = vpop.xlane.xlu0 %361 }
 0x560   :  { %2204 = vpow2.f32 %v365_v47  ;;  %v364_v49 = vsub.f32 %v354_v41, %v362_v48 }
 0x562   :  { %v367_v50 = vmul.f32 1.442695, %v364_v49 }
 0x564   :  { %2206 = vpow2.f32 %v367_v50  ;;  %v1796_v50 = vld [vmem:[%s2807_s3 + $0x6] ss:$0 sm:$0xff] }
 0x56a   :  { %v2205_v51 = vpop.eup %2204 }
 0x56b   :  { %v369_v52 = vsel %vm309_vm6, %v2205_v51, 0.0 }
 0x56c   :  { %370 = vadd.xlane.f32.xlu0 %v369_v52 }
 0x56e   :  { %v2207_v53 = vpop.eup %2206 }
 0x56f   :  { %v372_v54 = vsel %vm309_vm6, %v2207_v53, 0.0 }
 0x570   :  { %373 = vadd.xlane.f32.xlu0 %v372_v54 }
 0x586   :  { %430 = vrot.lane.b32.xlu0 %v2488_v30, %s2325_s1 }
 0x5f9   :  { %v371_v55 = vpop.xlane.xlu0 %370 }
 0x5fa   :  { %2208 = vrcp.f32 %v371_v55 }
 0x5fd   :  { %v374_v56 = vpop.xlane.xlu0 %373 }
 0x5fe   :  { %2210 = vrcp.f32 %v374_v56 }
 0x601   :  { %v431_v61 = vpop.permute.xlu0 %430 }
 0x602   :  { %v436_v63 = vsel %vm309_vm6, %v431_v61, 0 }
 0x604   :  { %v2209_v57 = vpop.eup %2208 }
 0x605   :  { %v377_v59 = vmul.f32 %v2209_v57, %v2205_v51 }
 0x608   :  { %v2211_v58 = vpop.eup %2210 }
 0x609   :  { %v378_v60 = vmul.f32 %v2211_v58, %v2207_v53 }
 0x60b   :  { %v379_v62 = vpack.c.bf16 %v378_v60, %v377_v59 }
 0x60d   :  { %1980 = vmatmul.mubr.msk.bf16.vlgmr.msra.gmra.mrb[8].mxu1 %vm309_vm6, %v379_v62 }
 0x60e   :  { %1984 = vmatpush3.bf16.xpose.msra.mxu1 %v436_v63  ;;  %1985 = vmatprep.mubr.msk.bf16.mxu1 %vm2321_vm5, %v2319_v11 }
 0x60f   :  { %2003 = vmatprep.subr.bf16.mxu1 %v2319_v11 }
 0x615   :  { %1986 = vmatmul.mubr.msk.bf16.vlgmr.msra.gmra.mrb[12].mxu1 %vm309_vm6, %v429_v0 }
 0x616   :  { %2007 = vmatprep.mubr.msk.bf16.mxu1 %vm2321_vm5, %v2319_v11 }
 0x6e0   :  { %v420_v1 = vpop.f32.mrb[8].mxu1 }
 0x6e1   :  { %v1981_v2 = vpop.f32.mrb[9].mxu1 }
 0x6e2   :  { %v423_v3 = vpop.f32.mrb[10].mxu1 }
 0x6e3   :  { %v1982_v4 = vpop.f32.mrb[11].mxu1 }
 0x6e8   :  { %v472_v5 = vpop.f32.mrb[12].mxu1 }
 0x6e9   :  { %v473_v6 = vadd.f32 %v472_v5, %v2504_v35  ;;  %v1987_v7 = vpop.f32.mrb[13].mxu1 }
 0x6ea   :  { %v475_v8 = vpop.f32.mrb[14].mxu1 }
 0x6eb   :  { %v476_v9 = vadd.f32 %v475_v8, %v2509_v37  ;;  %v1988_v10 = vpop.f32.mrb[15].mxu1  ;;  %v479_v12 = vsel %vm309_vm6, %v473_v6, -inf }
 0x6ec   :  { %480 = vmax.xlane.f32.xlu1 %v479_v12 }
 0x6ed   :  { %v482_v13 = vsel %vm309_vm6, %v476_v9, -inf }
 0x6ee   :  { %483 = vmax.xlane.f32.xlu0 %v482_v13 }
 0x779   :  { %v481_v14 = vpop.xlane.xlu1 %480 }
 0x77a   :  { %v485_v15 = vsub.f32 %v473_v6, %v481_v14  ;;  %v2185_v6 = vld [vmem:[%s2811_s7 + $0x8] sm:$0xff]  }
 0x77b   :  { %v484_v16 = vpop.xlane.xlu0 %483 }
 0x77c   :  { %v487_v19 = vmul.f32 1.442695, %v485_v15  ;;  %v486_v20 = vsub.f32 %v476_v9, %v484_v16  ;;  %v1800_v15 = vld [vmem:[%s2807_s3 + $0x2] ss:$0 sm:$0xff] }
 0x77e   :  { %2212 = vpow2.f32 %v487_v19  ;;  %v489_v21 = vmul.f32 1.442695, %v486_v20 }
 0x780   :  { %2214 = vpow2.f32 %v489_v21 }
 0x788   :  { %v2213_v22 = vpop.eup %2212 }
 0x789   :  { %v491_v23 = vsel %vm309_vm6, %v2213_v22, 0.0 }
 0x78a   :  { %v2215_v24 = vpop.eup %2214  ;;  %492 = vadd.xlane.f32.xlu1 %v491_v23 }
 0x78b   :  { %v494_v25 = vsel %vm309_vm6, %v2215_v24, 0.0 }
 0x78e   :  { %495 = vadd.xlane.f32.xlu1 %v494_v25 }
 0x79f   :  { %502 = vrot.lane.b32.xlu1 %v2488_v30, %s2326_s12  ;;  %v2182_v30 = vld [vmem:[%s2810_s6] sm:$0xff]  }
 0x817   :  { %v493_v26 = vpop.xlane.xlu1 %492 }
 0x818   :  { %2216 = vrcp.f32 %v493_v26 }
 0x81b   :  { %v496_v28 = vpop.xlane.xlu1 %495 }
 0x81c   :  { %2218 = vrcp.f32 %v496_v28  ;;  %v2186_v28 = vld [vmem:[%s2812_s8] sm:$0xff]  }
 0x81f   :  { %v503_v29 = vpop.permute.xlu1 %502 }
 0x820   :  { %1990 = vmatpush3.bf16.msra.mxu0 %v503_v29  ;;  %v2187_v29 = vld [vmem:[%s2812_s8 + $0x8] sm:$0xff]  }
 0x821   :  { %1995 = vmatprep.subr.bf16.mxu0 %v2319_v11 }
 0x822   :  { %v2217_v31 = vpop.eup %2216 }
 0x823   :  { %v499_v33 = vmul.f32 %v2217_v31, %v2213_v22  ;;  %v1801_v22 = vld [vmem:[%s2807_s3 + $0x3] ss:$0 sm:$0xff]  ;;  %v2188_v31 = vld [vmem:[%s2812_s8 + $0x10] sm:$0xff]  }
 0x826   :  { %v2219_v32 = vpop.eup %2218 }
 0x827   :  { %v500_v34 = vmul.f32 %v2219_v32, %v2215_v24  ;;  %v2189_v32 = vld [vmem:[%s2812_s8 + $0x18] sm:$0xff]  }
 0x829   :  { %v501_v36 = vpack.c.bf16 %v500_v34, %v499_v33  ;;  %v1802_v33 = vld [vmem:[%s2808_s4 + $0x2] ss:$0 sm:$0xff] }
 0x82b   :  { %1992 = vmatmul.mubr.msk.bf16.vlgmr.msra.gmra.mrb[4].mxu0 %vm309_vm6, %v501_v36 }
 0x82c   :  { %1999 = vmatprep.mubr.msk.bf16.mxu0 %vm2321_vm5, %v2319_v11  ;;  %1996 = vmatpush3.bf16.msra.mxu0 %v2182_v30 }
 0x82d   :  { %1997 = vmatprep.subr.bf16.mxu0 %v2319_v11 }
 0x830   :  { %1998 = vmatpush3.bf16.msra.mxu0 %v2183_v38 }
 0x831   :  { %2011 = vmatprep.subr.bf16.mxu0 %v2319_v11 }
 0x8fe   :  { %v542_v39 = vpop.f32.mrb[4].mxu0 }
 0x8ff   :  { %v1993_v40 = vpop.f32.mrb[5].mxu0 }
 0x900   :  { %v545_v41 = vpop.f32.mrb[6].mxu0 }
 0x901   :  { %v2159_v42 = vpack.i.bf16 %v545_v41, %v542_v39  ;;  %v1994_v43 = vpop.f32.mrb[7].mxu0 }
 0x903   :  { %2160 = vrot.lane.b32.xlu0 %v2159_v42, %s2327_s16 }
 0x975   :  { %v2161_v44 = vpop.permute.xlu0 %2160 }
 0x976   :  { %v2163_v45 = vunpack.i.h.bf16 %v2161_v44  ;;  %v2162_v46 = vunpack.i.l.bf16 %v2161_v44 }
 0x978   :  { %v558_v47 = vsel %vm309_vm6, %v423_v3, %v2163_v45  ;;  %v557_v48 = vsel %vm309_vm6, %v420_v1, %v2162_v46 }
 0x979   :  { %v563_v49 = vpack.c.bf16 %v558_v47, %v557_v48 }
 0x97b   :  { %2000 = vmatmul.mubr.msk.bf16.vlgmr.msra.gmra.mrb[8].mxu0 %vm187_vm4, %v563_v49 }
 0x97c   :  { %2019 = vmatprep.mubr.msk.bf16.mxu0 %vm2321_vm5, %v2319_v11  ;;  %2012 = vmatpush3.bf16.msra.mxu0 %v2186_v28  ;;  %v1812_v28 = vld [vmem:[%s2807_s3 + $0x4] ss:$0 sm:$0xff] }
 0x97d   :  { %2013 = vmatprep.subr.bf16.mxu0 %v2319_v11 }
 0x980   :  { %2014 = vmatpush3.bf16.msra.mxu0 %v2187_v29 }
 0x981   :  { %2015 = vmatprep.subr.bf16.mxu0 %v2319_v11 }
 0x984   :  { %2016 = vmatpush3.bf16.msra.mxu0 %v2188_v31 }
 0x985   :  { %2017 = vmatprep.subr.bf16.mxu0 %v2319_v11 }
 0x988   :  { %2018 = vmatpush3.bf16.msra.mxu0 %v2189_v32 }
 0x989   :  { %2037 = vmatprep.subr.bf16.mxu0 %v2319_v11 }
 0xa4e   :  { %v617_v51 = vpop.f32.mrb[8].mxu0 }
 0xa4f   :  { %v618_v52 = vadd.f32 %v1796_v50, %v617_v51  ;;  %v2001_v53 = vpop.f32.mrb[9].mxu0 }
 0xa50   :  { %v620_v54 = vpop.f32.mrb[10].mxu0 }
 0xa51   :  { %v621_v55 = vadd.f32 %v1796_v50, %v620_v54  ;;  %v2002_v56 = vpop.f32.mrb[11].mxu0  ;;  %v624_v57 = vadd.f32 %v618_v52, %v2476_v17 }
 0xa53   :  { %v626_v58 = vsel %vm187_vm4, %v624_v57, 0.0  ;;  %v625_v59 = vadd.f32 %v621_v55, %v2478_v18  ;;  %v2184_v18 = vld [vmem:[%s2811_s7] sm:$0xff]  }
 0xa54   :  { %627 = vadd.xlane.f32.xlu1 %v626_v58  ;;  %2004 = vmatpush3.bf16.msra.mxu1 %v2184_v18 }
 0xa55   :  { %v629_v60 = vsel %vm187_vm4, %v625_v59, 0.0  ;;  %2005 = vmatprep.subr.bf16.mxu1 %v2319_v11 }
 0xa56   :  { %630 = vadd.xlane.f32.xlu0 %v629_v60  ;;  %v1806_v60 = vld [vmem:[%s2807_s3 + $0x7] ss:$0 sm:$0xff] }
 0xa58   :  { %2006 = vmatpush3.bf16.msra.mxu1 %v2185_v6 }
 0xa59   :  { %2023 = vmatprep.subr.bf16.mxu1 %v2319_v11 }
 0xae1   :  { %v628_v61 = vpop.xlane.xlu1 %627 }
 0xae2   :  { %v632_v62 = vmul.f32 0.03125, %v628_v61 }
 0xae3   :  { %v631_v63 = vpop.xlane.xlu0 %630 }
 0xae4   :  { %v634_v0 = vsub.f32 %v624_v57, %v632_v62  ;;  %v633_v1 = vmul.f32 0.03125, %v631_v63 }
 0xae6   :  { %v635_v2 = vsub.f32 %v625_v59, %v633_v1  ;;  %v636_v3 = vmul.f32 %v634_v0, %v634_v0 }
 0xae8   :  { %v638_v4 = vsel %vm187_vm4, %v636_v3, 0.0  ;;  %v637_v5 = vmul.f32 %v635_v2, %v635_v2 }
 0xae9   :  { %639 = vadd.xlane.f32.xlu1 %v638_v4 }
 0xaea   :  { %v641_v17 = vsel %vm187_vm4, %v637_v5, 0.0 }
 0xaeb   :  { %642 = vadd.xlane.f32.xlu0 %v641_v17 }
 0xb76   :  { %v640_v7 = vpop.xlane.xlu1 %639 }
 0xb77   :  { %v644_v8 = vmul.f32 0.03125, %v640_v7 }
 0xb78   :  { %v643_v9 = vpop.xlane.xlu0 %642 }
 0xb79   :  { %v646_v10 = vadd.f32 1e-12, %v644_v8  ;;  %v645_v12 = vmul.f32 0.03125, %v643_v9 }
 0xb7b   :  { %2220 = vrsqrt.f32 %v646_v10  ;;  %v647_v13 = vadd.f32 1e-12, %v645_v12 }
 0xb7d   :  { %2222 = vrsqrt.f32 %v647_v13 }
 0xb85   :  { %v2221_v14 = vpop.eup %2220 }
 0xb86   :  { %v650_v16 = vmul.f32 %v2221_v14, %v634_v0 }
 0xb87   :  { %v2223_v19 = vpop.eup %2222 }
 0xb88   :  { %v656_v20 = vmul.f32 %v1800_v15, %v650_v16  ;;  %v651_v21 = vmul.f32 %v2223_v19, %v635_v2  ;;  %v2190_v16 = vld [vmem:[%s2809_s5 + $0x10] sm:$0xff]   ;;  %v2191_v19 = vld [vmem:[%s2809_s5 + $0x18] sm:$0xff]  }
 0xb8a   :  { %v657_v23 = vmul.f32 %v1800_v15, %v651_v21  ;;  %v662_v24 = vadd.f32 %v1801_v22, %v656_v20 }
 0xb8c   :  { %v663_v25 = vadd.f32 %v1801_v22, %v657_v23 }
 0xb8e   :  { %v668_v26 = vpack.c.bf16 %v663_v25, %v662_v24 }
 0xb90   :  { %2008 = vmatmul.mubr.msk.bf16.vlgmr.msra.gmra.mrb[16].mxu1 %vm187_vm4, %v668_v26 }
 0xb91   :  { %2027 = vmatprep.mubr.msk.bf16.mxu1 %vm2321_vm5, %v2319_v11  ;;  %2024 = vmatpush3.bf16.msra.mxu1 %v2190_v16 }
 0xb92   :  { %2025 = vmatprep.subr.bf16.mxu1 %v2319_v11 }
 0xb95   :  { %2026 = vmatpush3.bf16.msra.mxu1 %v2191_v19 }
 0xb96   :  { %2031 = vmatprep.subr.bf16.mxu1 %v2319_v11 }
 0xc63   :  { %v722_v34 = vpop.f32.mrb[16].mxu1 }
 0xc64   :  { %v723_v36 = vadd.f32 %v1802_v33, %v722_v34  ;;  %v2009_v30 = vpop.f32.mrb[17].mxu1  ;;  %v1813_v34 = vld [vmem:[%s2807_s3 + $0x5] ss:$0 sm:$0xff] }
 0xc65   :  { %v725_v38 = vpop.f32.mrb[18].mxu1 }
 0xc66   :  { %v731_v39 = vmul.f32 0.044715, %v723_v36  ;;  %v726_v40 = vadd.f32 %v1802_v33, %v725_v38  ;;  %v2010_v41 = vpop.f32.mrb[19].mxu1  ;;  %v729_v54 = vmul.f32 0.5, %v723_v36 }
 0xc68   :  { %v733_v42 = vmul.f32 %v731_v39, %v723_v36  ;;  %v732_v43 = vmul.f32 0.044715, %v726_v40  ;;  %v730_v55 = vmul.f32 0.5, %v726_v40 }
 0xc6a   :  { %v735_v44 = vmul.f32 %v733_v42, %v723_v36  ;;  %v734_v45 = vmul.f32 %v732_v43, %v726_v40 }
 0xc6c   :  { %v737_v46 = vadd.f32 %v735_v44, %v723_v36  ;;  %v736_v47 = vmul.f32 %v734_v45, %v726_v40 }
 0xc6e   :  { %v739_v48 = vmul.f32 0.7978846, %v737_v46  ;;  %v738_v49 = vadd.f32 %v736_v47, %v726_v40  ;;  %v1818_v40 = vld [vmem:[%s2808_s4 + $0x1] ss:$0 sm:$0xff] }
 0xc70   :  { %2224 = vtanh.f32 %v739_v48  ;;  %v740_v50 = vmul.f32 0.7978846, %v738_v49 }
 0xc72   :  { %2226 = vtanh.f32 %v740_v50 }
 0xc7a   :  { %v2225_v51 = vpop.eup %2224 }
 0xc7b   :  { %v743_v52 = vadd.f32 1.0, %v2225_v51 }
 0xc7c   :  { %v2227_v53 = vpop.eup %2226 }
 0xc7d   :  { %v744_v56 = vadd.f32 1.0, %v2227_v53  ;;  %v745_v57 = vmul.f32 %v743_v52, %v729_v54 }
 0xc7f   :  { %v746_v58 = vmul.f32 %v744_v56, %v730_v55 }
 0xc81   :  { %v755_v59 = vpack.c.bf16 %v746_v58, %v745_v57 }
 0xc83   :  { %2020 = vmatmul.mubr.msk.bf16.vlgmr.msra.gmra.mrb[12].mxu0 %vm784_vm7, %v755_v59 }
 0xc84   :  { %2039 = vmatprep.mubr.msk.bf16.mxu0 %vm2321_vm5, %v2319_v11 }
 0xd56   :  { %v822_v61 = vpop.f32.mrb[12].mxu0 }
 0xd57   :  { %v823_v62 = vadd.f32 %v1806_v60, %v822_v61  ;;  %v2021_v63 = vpop.f32.mrb[13].mxu0 }
 0xd58   :  { %v825_v0 = vpop.f32.mrb[14].mxu0 }
 0xd59   :  { %v826_v1 = vadd.f32 %v1806_v60, %v825_v0  ;;  %v2022_v2 = vpop.f32.mrb[15].mxu0  ;;  %v829_v3 = vadd.f32 %v823_v62, %v662_v24 }
 0xd5b   :  { %v831_v4 = vsel %vm187_vm4, %v829_v3, 0.0  ;;  %v830_v5 = vadd.f32 %v826_v1, %v663_v25 }
 0xd5c   :  { %832 = vadd.xlane.f32.xlu1 %v831_v4 }
 0xd5d   :  { %v834_v17 = vsel %vm187_vm4, %v830_v5, 0.0 }
 0xd5e   :  { %835 = vadd.xlane.f32.xlu0 %v834_v17 }
 0xde9   :  { %v833_v18 = vpop.xlane.xlu1 %832 }
 0xdea   :  { %v837_v6 = vmul.f32 0.03125, %v833_v18 }
 0xdeb   :  { %v836_v7 = vpop.xlane.xlu0 %835 }
 0xdec   :  { %v839_v8 = vsub.f32 %v829_v3, %v837_v6  ;;  %v838_v9 = vmul.f32 0.03125, %v836_v7 }
 0xdee   :  { %v840_v10 = vsub.f32 %v830_v5, %v838_v9  ;;  %v841_v12 = vmul.f32 %v839_v8, %v839_v8 }
 0xdf0   :  { %v843_v13 = vsel %vm187_vm4, %v841_v12, 0.0  ;;  %v842_v14 = vmul.f32 %v840_v10, %v840_v10 }
 0xdf1   :  { %844 = vadd.xlane.f32.xlu1 %v843_v13 }
 0xdf2   :  { %v846_v15 = vsel %vm187_vm4, %v842_v14, 0.0 }
 0xdf3   :  { %847 = vadd.xlane.f32.xlu0 %v846_v15 }
 0xe7e   :  { %v845_v20 = vpop.xlane.xlu1 %844 }
 0xe7f   :  { %v849_v21 = vmul.f32 0.03125, %v845_v20 }
 0xe80   :  { %v848_v22 = vpop.xlane.xlu0 %847 }
 0xe81   :  { %v851_v23 = vadd.f32 1e-12, %v849_v21  ;;  %v850_v24 = vmul.f32 0.03125, %v848_v22 }
 0xe83   :  { %2228 = vrsqrt.f32 %v851_v23  ;;  %v852_v25 = vadd.f32 1e-12, %v850_v24 }
 0xe85   :  { %2230 = vrsqrt.f32 %v852_v25 }
 0xe8d   :  { %v2229_v26 = vpop.eup %2228 }
 0xe8e   :  { %v855_v29 = vmul.f32 %v2229_v26, %v839_v8 }
 0xe8f   :  { %v2231_v31 = vpop.eup %2230 }
 0xe90   :  { %v861_v32 = vmul.f32 %v1812_v28, %v855_v29  ;;  %v856_v33 = vmul.f32 %v2231_v31, %v840_v10 }
 0xe92   :  { %v862_v36 = vmul.f32 %v1812_v28, %v856_v33  ;;  %v2622_v30 = vadd.f32 %v1813_v34, %v861_v32 }
 0xe94   :  { %v2624_v38 = vadd.f32 %v1813_v34, %v862_v36 }
 0xe96   :  { %v882_v39 = vpack.c.bf16 %v2624_v38, %v2622_v30 }
 0xe98   :  { %2028 = vmatmul.mubr.msk.bf16.vlgmr.msra.gmra.mrb[20].mxu1 %vm187_vm4, %v882_v39 }
 0xe99   :  { %2033 = vmatprep.mubr.msk.bf16.mxu1 %vm2321_vm5, %v2319_v11 }
 0xf6b   :  { %v936_v41 = vpop.f32.mrb[20].mxu1 }
 0xf6c   :  { %v937_v42 = vadd.f32 %v1818_v40, %v936_v41  ;;  %v2029_v43 = vpop.f32.mrb[21].mxu1 }
 0xf6d   :  { %v939_v44 = vpop.f32.mrb[22].mxu1 }
 0xf6e   :  { %v940_v45 = vadd.f32 %v1818_v40, %v939_v44  ;;  %v2030_v46 = vpop.f32.mrb[23].mxu1  ;;  %v943_v47 = vmul.f32 0.25, %v937_v42 }
 0xf70   :  { %v944_v48 = vmul.f32 0.25, %v940_v45  ;;  %v2634_v49 = vpack.c.bf16 %v940_v45, %v937_v42 }
 0xf72   :  { %1070 = vrot.lane.b32.xlu0 %v2634_v49, %s2325_s1  ;;  %948 = vrot.lane.b32.xlu1 %v2634_v49, %s2322_s24  ;;  %v945_v50 = vpack.c.bf16 %v944_v48, %v943_v47  ;;  %v2192_v48 = vld [vmem:[%s2810_s6 + $0x10] sm:$0xff]  }
 0xf76   :  { %1068 = vrot.lane.b32.xlu1 %v945_v50, %s2324_s26 }
 0xfe4   :  { %v949_v51 = vpop.permute.xlu1 %948  ;;  %v1071_v53 = vpop.permute.xlu0 %1070 }
 0xfe5   :  { %v954_v52 = vsel %vm309_vm6, %v949_v51, 0  ;;  %v1076_v54 = vsel %vm309_vm6, %v1071_v53, 0  ;;  %v2193_v51 = vld [vmem:[%s2810_s6 + $0x18] sm:$0xff]  }
 0xfe6   :  { %2032 = vmatpush3.bf16.xpose.msra.mxu1 %v954_v52 }
 0xfe7   :  { %2043 = vmatprep.subr.bf16.mxu1 %v2319_v11 }
 0xfe8   :  { %v1069_v55 = vpop.permute.xlu1 %1068 }
 0xfed   :  { %2034 = vmatmul.mubr.msk.bf16.vlgmr.msra.gmra.mrb[24].mxu1 %vm309_vm6, %v945_v50 }
 0xfee   :  { %2044 = vmatpush3.bf16.xpose.msra.mxu1 %v1076_v54  ;;  %2045 = vmatprep.mubr.msk.bf16.mxu1 %vm2321_vm5, %v2319_v11 }
 0xfef   :  { %2055 = vmatprep.subr.bf16.mxu1 %v2319_v11 }
 0xff5   :  { %2046 = vmatmul.mubr.msk.bf16.vlgmr.msra.gmra.mrb[28].mxu1 %vm309_vm6, %v1069_v55 }
 0xff6   :  { %2059 = vmatprep.mubr.msk.bf16.mxu1 %vm2321_vm5, %v2319_v11  ;;  %2056 = vmatpush3.bf16.msra.mxu1 %v2192_v48 }
 0xff7   :  { %2057 = vmatprep.subr.bf16.mxu1 %v2319_v11 }
 0xffa   :  { %2058 = vmatpush3.bf16.msra.mxu1 %v2193_v51 }
 0xffb   :  { %2071 = vmatprep.subr.bf16.mxu1 %v2319_v11 }
0x10c0   :  { %v990_v56 = vpop.f32.mrb[24].mxu1 }
0x10c1   :  { %v991_v57 = vadd.f32 %v990_v56, %v2504_v35  ;;  %v2035_v58 = vpop.f32.mrb[25].mxu1 }
0x10c2   :  { %v993_v59 = vpop.f32.mrb[26].mxu1 }
0x10c3   :  { %v994_v60 = vadd.f32 %v993_v59, %v2509_v37  ;;  %v2036_v61 = vpop.f32.mrb[27].mxu1  ;;  %v997_v62 = vsel %vm309_vm6, %v991_v57, -inf }
0x10c4   :  { %998 = vmax.xlane.f32.xlu1 %v997_v62 }
0x10c5   :  { %v1000_v63 = vsel %vm309_vm6, %v994_v60, -inf }
0x10c6   :  { %1001 = vmax.xlane.f32.xlu0 %v1000_v63 }
0x10c8   :  { %v1112_v0 = vpop.f32.mrb[28].mxu1 }
0x10c9   :  { %v1113_v1 = vadd.f32 %v1112_v0, %v2504_v35  ;;  %v2047_v2 = vpop.f32.mrb[29].mxu1 }
0x10ca   :  { %v1115_v3 = vpop.f32.mrb[30].mxu1 }
0x10cb   :  { %v1116_v4 = vadd.f32 %v1115_v3, %v2509_v37  ;;  %v2048_v5 = vpop.f32.mrb[31].mxu1  ;;  %v1119_v17 = vsel %vm309_vm6, %v1113_v1, -inf }
0x10cc   :  { %1120 = vmax.xlane.f32.xlu0 %v1119_v17 }
0x10cd   :  { %v1122_v18 = vsel %vm309_vm6, %v1116_v4, -inf }
0x10ce   :  { %1123 = vmax.xlane.f32.xlu1 %v1122_v18 }
0x1151   :  { %v999_v6 = vpop.xlane.xlu1 %998 }
0x1152   :  { %v1003_v7 = vsub.f32 %v991_v57, %v999_v6 }
0x1153   :  { %v1002_v8 = vpop.xlane.xlu0 %1001 }
0x1154   :  { %v1005_v9 = vmul.f32 1.442695, %v1003_v7  ;;  %v1004_v10 = vsub.f32 %v994_v60, %v1002_v8 }
0x1156   :  { %2232 = vpow2.f32 %v1005_v9  ;;  %v1007_v12 = vmul.f32 1.442695, %v1004_v10 }
0x1158   :  { %2234 = vpow2.f32 %v1007_v12 }
0x1159   :  { %v1121_v35 = vpop.xlane.xlu0 %1120 }
0x115a   :  { %v1125_v13 = vsub.f32 %v1113_v1, %v1121_v35  ;;  %v1830_v1 = vld [vmem:[%s2807_s3 + $0xc] ss:$0 sm:$0xff] }
0x115b   :  { %v1124_v14 = vpop.xlane.xlu1 %1123 }
0x115c   :  { %v1127_v15 = vmul.f32 1.442695, %v1125_v13  ;;  %v1126_v37 = vsub.f32 %v1116_v4, %v1124_v14 }
0x115e   :  { %2236 = vpow2.f32 %v1127_v15  ;;  %v1129_v16 = vmul.f32 1.442695, %v1126_v37 }
0x1160   :  { %v2233_v19 = vpop.eup %2232  ;;  %2238 = vpow2.f32 %v1129_v16 }
0x1161   :  { %v1009_v20 = vsel %vm309_vm6, %v2233_v19, 0.0 }
0x1162   :  { %v2235_v21 = vpop.eup %2234  ;;  %1010 = vadd.xlane.f32.xlu0 %v1009_v20  ;;  %v2195_v20 = vld [vmem:[%s2811_s7 + $0x18] sm:$0xff]  }
0x1163   :  { %v1012_v22 = vsel %vm309_vm6, %v2235_v21, 0.0 }
0x1164   :  { %1013 = vadd.xlane.f32.xlu1 %v1012_v22 }
0x1168   :  { %v2237_v23 = vpop.eup %2236 }
0x1169   :  { %v1131_v24 = vsel %vm309_vm6, %v2237_v23, 0.0 }
0x116a   :  { %v2239_v25 = vpop.eup %2238  ;;  %1132 = vadd.xlane.f32.xlu0 %v1131_v24 }
0x116b   :  { %v1134_v26 = vsel %vm309_vm6, %v2239_v25, 0.0 }
0x116c   :  { %1135 = vadd.xlane.f32.xlu1 %v1134_v26 }
0x117d   :  { %1142 = vrot.lane.b32.xlu1 %v2634_v49, %s2326_s12 }
0x1180   :  { %1020 = vrot.lane.b32.xlu0 %v2634_v49, %s2323_s25 }
0x11ef   :  { %v1011_v28 = vpop.xlane.xlu0 %1010 }
0x11f0   :  { %2240 = vrcp.f32 %v1011_v28 }
0x11f1   :  { %v1014_v29 = vpop.xlane.xlu1 %1013 }
0x11f2   :  { %2242 = vrcp.f32 %v1014_v29 }
0x11f7   :  { %v1133_v31 = vpop.xlane.xlu0 %1132 }
0x11f8   :  { %2244 = vrcp.f32 %v1133_v31  ;;  %v1834_v31 = vld [vmem:[%s2807_s3 + $0x8] ss:$0 sm:$0xff] }
0x11f9   :  { %v1136_v32 = vpop.xlane.xlu1 %1135 }
0x11fa   :  { %v2241_v33 = vpop.eup %2240  ;;  %2246 = vrcp.f32 %v1136_v32 }
0x11fb   :  { %v1021_v34 = vpop.permute.xlu0 %1020  ;;  %v1017_v39 = vmul.f32 %v2241_v33, %v2233_v19 }
0x11fc   :  { %v2243_v36 = vpop.eup %2242  ;;  %2038 = vmatpush3.bf16.msra.mxu0 %v1021_v34 }
0x11fd   :  { %v1018_v40 = vmul.f32 %v2243_v36, %v2235_v21  ;;  %2049 = vmatprep.subr.bf16.mxu0 %v2319_v11  ;;  %v1143_v42 = vpop.permute.xlu1 %1142  ;;  %v1835_v36 = vld [vmem:[%s2807_s3 + $0x9] ss:$0 sm:$0xff] }
0x11ff   :  { %v1019_v41 = vpack.c.bf16 %v1018_v40, %v1017_v39 }
0x1201   :  { %2040 = vmatmul.mubr.msk.bf16.vlgmr.msra.gmra.mrb[16].mxu0 %vm309_vm6, %v1019_v41 }
0x1202   :  { %v2245_v43 = vpop.eup %2244  ;;  %2050 = vmatpush3.bf16.msra.mxu0 %v1143_v42  ;;  %2051 = vmatprep.mubr.msk.bf16.mxu0 %vm2321_vm5, %v2319_v11 }
0x1203   :  { %2063 = vmatprep.subr.bf16.mxu0 %v2319_v11  ;;  %v1139_v45 = vmul.f32 %v2245_v43, %v2237_v23  ;;  %v2196_v43 = vld [vmem:[%s2812_s8 + $0x20] sm:$0xff]  }
0x1204   :  { %v2247_v44 = vpop.eup %2246 }
0x1205   :  { %v1140_v46 = vmul.f32 %v2247_v44, %v2239_v25  ;;  %v2197_v44 = vld [vmem:[%s2812_s8 + $0x28] sm:$0xff]  }
0x1207   :  { %v1141_v47 = vpack.c.bf16 %v1140_v46, %v1139_v45  ;;  %v2198_v45 = vld [vmem:[%s2812_s8 + $0x30] sm:$0xff]   ;;  %v2199_v46 = vld [vmem:[%s2812_s8 + $0x38] sm:$0xff]  }
0x1209   :  { %2052 = vmatmul.mubr.msk.bf16.vlgmr.msra.gmra.mrb[20].mxu0 %vm309_vm6, %v1141_v47  ;;  %v1840_v47 = vld [vmem:[%s2808_s4 + $0x3] ss:$0 sm:$0xff] }
0x120a   :  { %2067 = vmatprep.mubr.msk.bf16.mxu0 %vm2321_vm5, %v2319_v11 }
0x12d4   :  { %v1060_v49 = vpop.f32.mrb[16].mxu0 }
0x12d5   :  { %v2041_v50 = vpop.f32.mrb[17].mxu0 }
0x12d6   :  { %v1063_v52 = vpop.f32.mrb[18].mxu0 }
0x12d7   :  { %v2042_v53 = vpop.f32.mrb[19].mxu0 }
0x12dc   :  { %v1182_v54 = vpop.f32.mrb[20].mxu0 }
0x12dd   :  { %v2053_v55 = vpop.f32.mrb[21].mxu0 }
0x12de   :  { %v1185_v56 = vpop.f32.mrb[22].mxu0 }
0x12df   :  { %v2164_v57 = vpack.i.bf16 %v1185_v56, %v1182_v54  ;;  %v2054_v58 = vpop.f32.mrb[23].mxu0 }
0x12e1   :  { %2165 = vrot.lane.b32.xlu1 %v2164_v57, %s2327_s16 }
0x1353   :  { %v2166_v59 = vpop.permute.xlu1 %2165 }
0x1354   :  { %v2168_v60 = vunpack.i.h.bf16 %v2166_v59  ;;  %v2167_v61 = vunpack.i.l.bf16 %v2166_v59 }
0x1356   :  { %v1198_v62 = vsel %vm309_vm6, %v1063_v52, %v2168_v60  ;;  %v1197_v63 = vsel %vm309_vm6, %v1060_v49, %v2167_v61 }
0x1357   :  { %v1204_v0 = vpack.c.bf16 %v1198_v62, %v1197_v63 }
0x1359   :  { %2060 = vmatmul.mubr.msk.bf16.vlgmr.msra.gmra.mrb[32].mxu1 %vm187_vm4, %v1204_v0 }
0x135a   :  { %2079 = vmatprep.mubr.msk.bf16.mxu1 %vm2321_vm5, %v2319_v11  ;;  %2072 = vmatpush3.bf16.msra.mxu1 %v2196_v43 }
0x135b   :  { %2073 = vmatprep.subr.bf16.mxu1 %v2319_v11 }
0x135e   :  { %2074 = vmatpush3.bf16.msra.mxu1 %v2197_v44 }
0x135f   :  { %2075 = vmatprep.subr.bf16.mxu1 %v2319_v11 }
0x1362   :  { %2076 = vmatpush3.bf16.msra.mxu1 %v2198_v45 }
0x1363   :  { %2077 = vmatprep.subr.bf16.mxu1 %v2319_v11 }
0x1366   :  { %2078 = vmatpush3.bf16.msra.mxu1 %v2199_v46 }
0x142c   :  { %v1258_v2 = vpop.f32.mrb[32].mxu1 }
0x142d   :  { %v1259_v3 = vadd.f32 %v1830_v1, %v1258_v2  ;;  %v2061_v4 = vpop.f32.mrb[33].mxu1 }
0x142e   :  { %v1261_v5 = vpop.f32.mrb[34].mxu1 }
0x142f   :  { %v1262_v17 = vadd.f32 %v1830_v1, %v1261_v5  ;;  %v2062_v18 = vpop.f32.mrb[35].mxu1  ;;  %v1265_v6 = vadd.f32 %v1259_v3, %v2622_v30 }
0x1431   :  { %v1267_v7 = vsel %vm187_vm4, %v1265_v6, 0.0  ;;  %v1266_v8 = vadd.f32 %v1262_v17, %v2624_v38  ;;  %v2194_v38 = vld [vmem:[%s2811_s7 + $0x10] sm:$0xff]  }
0x1432   :  { %1268 = vadd.xlane.f32.xlu0 %v1267_v7  ;;  %2064 = vmatpush3.bf16.msra.mxu0 %v2194_v38  ;;  %v1852_v7 = vld [vmem:[%s2807_s3 + $0xd] ss:$0 sm:$0xff] }
0x1433   :  { %v1270_v9 = vsel %vm187_vm4, %v1266_v8, 0.0  ;;  %2065 = vmatprep.subr.bf16.mxu0 %v2319_v11 }
0x1434   :  { %1271 = vadd.xlane.f32.xlu1 %v1270_v9 }
0x1436   :  { %2066 = vmatpush3.bf16.msra.mxu0 %v2195_v20 }
0x14bf   :  { %v1269_v10 = vpop.xlane.xlu0 %1268 }
0x14c0   :  { %v1273_v12 = vmul.f32 0.03125, %v1269_v10 }
0x14c1   :  { %v1272_v35 = vpop.xlane.xlu1 %1271 }
0x14c2   :  { %v1275_v13 = vsub.f32 %v1265_v6, %v1273_v12  ;;  %v1274_v14 = vmul.f32 0.03125, %v1272_v35 }
0x14c4   :  { %v1276_v15 = vsub.f32 %v1266_v8, %v1274_v14  ;;  %v1277_v37 = vmul.f32 %v1275_v13, %v1275_v13 }
0x14c6   :  { %v1279_v16 = vsel %vm187_vm4, %v1277_v37, 0.0  ;;  %v1278_v19 = vmul.f32 %v1276_v15, %v1276_v15 }
0x14c7   :  { %1280 = vadd.xlane.f32.xlu0 %v1279_v16 }
0x14c8   :  { %v1282_v30 = vsel %vm187_vm4, %v1278_v19, 0.0 }
0x14cb   :  { %1283 = vadd.xlane.f32.xlu0 %v1282_v30 }
0x1554   :  { %v1281_v21 = vpop.xlane.xlu0 %1280 }
0x1555   :  { %v1285_v22 = vmul.f32 0.03125, %v1281_v21 }
0x1557   :  { %v1287_v23 = vadd.f32 1e-12, %v1285_v22 }
0x1558   :  { %v1284_v24 = vpop.xlane.xlu0 %1283 }
0x1559   :  { %2248 = vrsqrt.f32 %v1287_v23  ;;  %v1286_v25 = vmul.f32 0.03125, %v1284_v24 }
0x155b   :  { %v1288_v26 = vadd.f32 1e-12, %v1286_v25 }
0x155d   :  { %2250 = vrsqrt.f32 %v1288_v26 }
0x1563   :  { %v2249_v28 = vpop.eup %2248 }
0x1564   :  { %v1291_v29 = vmul.f32 %v2249_v28, %v1275_v13  ;;  %v1513_v28 = vld [vmem:[%s2813_s9] sm:$0xff] }
0x1566   :  { %v1297_v33 = vmul.f32 %v1834_v31, %v1291_v29  ;;  %v1514_v29 = vld [vmem:[%s2813_s9 + $0x8] sm:$0xff] }
0x1567   :  { %v2251_v32 = vpop.eup %2250 }
0x1568   :  { %v1292_v34 = vmul.f32 %v2251_v32, %v1276_v15  ;;  %v1303_v40 = vadd.f32 %v1835_v36, %v1297_v33  ;;  %v2328_v32 = vmov 0.0|0.0   ;;  %v2130_v33 = vpack.c.bf16 %v1514_v29, %v1513_v28 }
0x1569   :  { %2129 = vmatprep.subr.bf16.mxu0 %v2328_v32 }
0x156a   :  { %v1298_v39 = vmul.f32 %v1834_v31, %v1292_v34  ;;  %v1515_v31 = vld [vmem:[%s2813_s9 + $0x10] sm:$0xff]  ;;  %v1516_v34 = vld [vmem:[%s2813_s9 + $0x18] sm:$0xff] }
0x156c   :  { %v1304_v41 = vadd.f32 %v1835_v36, %v1298_v39  ;;  %v2133_v36 = vpack.c.bf16 %v1516_v34, %v1515_v31  ;;  %v2169_v39 = vpack.i.bf16 %v1514_v29, %v1513_v28 }
0x156e   :  { %v1310_v42 = vpack.c.bf16 %v1304_v41, %v1303_v40 }
0x1570   :  { %2068 = vmatmul.mubr.msk.bf16.vlgmr.msra.gmra.mrb[24].mxu0 %vm187_vm4, %v1310_v42 }
0x1571   :  { %2091 = vmatprep.mubr.msk.f32.mxu0 %vm2321_vm5, %v2319_v11  ;;  %2131 = vmatpush3.bf16.msra.mxu0 %v2130_v33 }
0x1572   :  { %2132 = vmatprep.subr.bf16.mxu0 %v2328_v32 }
0x1575   :  { %2134 = vmatpush3.bf16.msra.mxu0 %v2133_v36 }
0x1576   :  { %2135 = vmatprep.subr.bf16.mxu0 %v2328_v32 }
0x1643   :  { %v1364_v48 = vpop.f32.mrb[24].mxu0 }
0x1644   :  { %v1365_v49 = vadd.f32 %v1840_v47, %v1364_v48  ;;  %v2069_v50 = vpop.f32.mrb[25].mxu0 }
0x1645   :  { %v1367_v51 = vpop.f32.mrb[26].mxu0  ;;  %v1858_v50 = vld [vmem:[%s2807_s3 + $0xa] ss:$0 sm:$0xff] }
0x1646   :  { %v1373_v52 = vmul.f32 0.044715, %v1365_v49  ;;  %v1368_v53 = vadd.f32 %v1840_v47, %v1367_v51  ;;  %v2070_v54 = vpop.f32.mrb[27].mxu0  ;;  %v1371_v3 = vmul.f32 0.5, %v1365_v49 }
0x1647   :  { %v1859_v54 = vld [vmem:[%s2807_s3 + $0xb] ss:$0 sm:$0xff] }
0x1648   :  { %v1375_v55 = vmul.f32 %v1373_v52, %v1365_v49  ;;  %v1374_v56 = vmul.f32 0.044715, %v1368_v53  ;;  %v1372_v4 = vmul.f32 0.5, %v1368_v53 }
0x164a   :  { %v1377_v57 = vmul.f32 %v1375_v55, %v1365_v49  ;;  %v1376_v58 = vmul.f32 %v1374_v56, %v1368_v53 }
0x164c   :  { %v1379_v59 = vadd.f32 %v1377_v57, %v1365_v49  ;;  %v1378_v60 = vmul.f32 %v1376_v58, %v1368_v53 }
0x164e   :  { %v1381_v61 = vmul.f32 0.7978846, %v1379_v59  ;;  %v1380_v62 = vadd.f32 %v1378_v60, %v1368_v53 }
0x1650   :  { %2252 = vtanh.f32 %v1381_v61  ;;  %v1382_v63 = vmul.f32 0.7978846, %v1380_v62 }
0x1652   :  { %2254 = vtanh.f32 %v1382_v63 }
0x165a   :  { %v2253_v0 = vpop.eup %2252 }
0x165b   :  { %v1385_v1 = vadd.f32 1.0, %v2253_v0 }
0x165c   :  { %v2255_v2 = vpop.eup %2254 }
0x165d   :  { %v1386_v5 = vadd.f32 1.0, %v2255_v2  ;;  %v1387_v17 = vmul.f32 %v1385_v1, %v1371_v3  ;;  %v1693_v3 = vld [vmem:[%s2804_s0] sm:$0x3]  ;;  %s2330_s0 = smov [#allocation4]  }
0x165f   :  { %v1388_v18 = vmul.f32 %v1386_v5, %v1372_v4  ;;  %v2329_v4 = vmov 2   ;;  %v1860_v5 = vld [vmem:[%s2807_s3 + $0xe] ss:$0 sm:$0xff]  ;;  %s1769_s3 = sshll.u32 %s2330_s0, 4  ;;  %s1770_s3 = int_to_ptr.vmem [resolvable:$true] %s1769_s3 }
0x1660   :  { %2179 = vset.pattern.permute.xlu0 %v2329_v4  ;;  %p2275_p1 = scmp.lt.s32.totalorder %s1770_s3, %s1770_s3 }
0x1661   :  { %v1398_v6 = vpack.c.bf16 %v1388_v18, %v1387_v17 }
0x1663   :  { %2080 = vmatmul.mubr.msk.bf16.vlgmr.msra.gmra.mrb[36].mxu1 %vm784_vm7, %v1398_v6 }
0x1736   :  { %v1464_v8 = vpop.f32.mrb[36].mxu1 }
0x1737   :  { %v1465_v9 = vadd.f32 %v1852_v7, %v1464_v8  ;;  %v2081_v10 = vpop.f32.mrb[37].mxu1 }
0x1738   :  { %v1467_v12 = vpop.f32.mrb[38].mxu1 }
0x1739   :  { %v1468_v35 = vadd.f32 %v1852_v7, %v1467_v12  ;;  %v2082_v13 = vpop.f32.mrb[39].mxu1  ;;  %v1471_v14 = vadd.f32 %v1465_v9, %v1303_v40  ;;  %v2174_v40 = vpack.i.bf16 %v1516_v34, %v1515_v31  ;;  %v1862_v9 = vld [vmem:[%s2808_s4 + $0x4] ss:$0 sm:$0xff]  ;;  %s2270_s4 = scalar_lea.vmem %s1770_s3, 32 }
0x173a   :  { %p2271_p0 = scmp.ne.s32.totalorder %s1770_s3, %s2270_s4  ;;  %p2276_p2 = scmp.lt.s32.totalorder %s2270_s4, %s2270_s4 }
0x173b   :  { %v1473_v15 = vsel %vm187_vm4, %v1471_v14, 0.0  ;;  %v1472_v37 = vadd.f32 %v1468_v35, %v1304_v41 }
0x173c   :  { %1474 = vadd.xlane.f32.xlu0 %v1473_v15  ;;  %p2277_p3 = por %p2276_p2, %p2275_p1 }
0x173d   :  { %v1476_v16 = vsel %vm187_vm4, %v1472_v37, 0.0 }
0x173e   :  { %1477 = vadd.xlane.f32.xlu1 %v1476_v16  ;;  %p2278_p4 = pnand %p2277_p3, %p2271_p0 }
0x17c9   :  { %v1475_v19 = vpop.xlane.xlu0 %1474 }
0x17ca   :  { %v1479_v30 = vmul.f32 0.03125, %v1475_v19 }
0x17cb   :  { %v1478_v38 = vpop.xlane.xlu1 %1477 }
0x17cc   :  { %v1481_v20 = vsub.f32 %v1471_v14, %v1479_v30  ;;  %v1480_v21 = vmul.f32 0.03125, %v1478_v38 }
0x17ce   :  { %v1482_v22 = vsub.f32 %v1472_v37, %v1480_v21  ;;  %v1483_v23 = vmul.f32 %v1481_v20, %v1481_v20 }
0x17d0   :  { %v1485_v24 = vsel %vm187_vm4, %v1483_v23, 0.0  ;;  %v1484_v25 = vmul.f32 %v1482_v22, %v1482_v22 }
0x17d1   :  { %1486 = vadd.xlane.f32.xlu0 %v1485_v24 }
0x17d2   :  { %v1488_v26 = vsel %vm187_vm4, %v1484_v25, 0.0 }
0x17d3   :  { %1489 = vadd.xlane.f32.xlu1 %v1488_v26 }
0x17e4   :  { %2170 = vrot.lane.b32.xlu1 %v2169_v39, %s2322_s24 }
0x17e7   :  { %2175 = vrot.lane.b32.xlu0 %v2174_v40, %s2322_s24 }
0x17eb   :  { %1695 = vperm.xlu0 %2179, %v1693_v3  }
0x185e   :  { %v1487_v41 = vpop.xlane.xlu0 %1486 }
0x185f   :  { %v1491_v42 = vmul.f32 0.03125, %v1487_v41 }
0x1860   :  { %v1490_v43 = vpop.xlane.xlu1 %1489 }
0x1861   :  { %v1493_v44 = vadd.f32 1e-12, %v1491_v42  ;;  %v1492_v45 = vmul.f32 0.03125, %v1490_v43 }
0x1862   :  { %v2176_v60 = vpop.permute.xlu0 %2175 }
0x1863   :  { %2256 = vrsqrt.f32 %v1493_v44  ;;  %v1494_v46 = vadd.f32 1e-12, %v1492_v45  ;;  %v2178_v63 = vunpack.i.h.bf16 %v2176_v60  ;;  %v2177_v0 = vunpack.i.l.bf16 %v2176_v60 }
0x1864   :  { %v2171_v59 = vpop.permute.xlu1 %2170 }
0x1865   :  { %2258 = vrsqrt.f32 %v1494_v46  ;;  %v2173_v61 = vunpack.i.h.bf16 %v2171_v59  ;;  %v2172_v62 = vunpack.i.l.bf16 %v2171_v59  ;;  %v2139_v2 = vpack.c.bf16 %v2178_v63, %v2177_v0 }
0x1867   :  { %v2136_v1 = vpack.c.bf16 %v2173_v61, %v2172_v62 }
0x186a   :  { %v1696_v8 = vpop.permute.xlu0 %1695 }
0x186b   :  { %vm1697_vm9 = vcmp.eq.s32.totalorder %v2439_v27, %v1696_v8 }
0x186c   :  { %v1864_v10 = vsel %vm1697_vm9, 1.0, %v2319_v11 }
0x186d   :  { %v2257_v47 = vpop.eup %2256 }
0x186e   :  { %v1497_v48 = vmul.f32 %v2257_v47, %v1481_v20 }
0x186f   :  { %v2259_v49 = vpop.eup %2258 }
0x1870   :  { %v1498_v51 = vmul.f32 %v2259_v49, %v1482_v22  ;;  %v1503_v52 = vmul.f32 %v1858_v50, %v1497_v48 }
0x1872   :  { %v1504_v53 = vmul.f32 %v1858_v50, %v1498_v51  ;;  %v1509_v56 = vadd.f32 %v1859_v54, %v1503_v52 }
0x1874   :  { %v1510_v55 = vadd.f32 %v1859_v54, %v1504_v53 }
0x1876   :  { %v1518_v57 = vrot.slane %v1510_v55, 7 }
0x1878   :  { %v1521_v58 = vsel %vm1520_vm8, %v1509_v56, %v1518_v57 }
0x1879   :  { %2092 = vmatmul.mubr.msk.f32.vlgmr.msra.gmra.mrb[2].mxu0 %vm187_vm4, %v1521_v58 }
0x187a   :  { %2102 = vmatprep.mubr.msk.f32.mxu0 %vm2321_vm5, %v2319_v11  ;;  %2137 = vmatpush3.bf16.msra.mxu0 %v2136_v1 }
0x187b   :  { %2138 = vmatprep.subr.bf16.mxu0 %v2328_v32 }
0x187e   :  { %2140 = vmatpush3.bf16.msra.mxu0 %v2139_v2 }
0x194c   :  { %v1595_v17 = vpop.f32.mrb[2].mxu0 }
0x194d   :  { %v1596_v18 = vadd.f32 %v1860_v5, %v1595_v17  ;;  %v2093_v6 = vpop.f32.mrb[3].mxu0 }
0x194f   :  { %2260 = vtanh.f32 %v1596_v18 }
0x1959   :  { %v2261_v7 = vpop.eup %2260 }
0x195a   :  { %2103 = vmatmul.mubr.msk.f32.vlgmr.msra.gmra.mrb[28].mxu0 %vm187_vm4, %v2261_v7 }
0x1a2d   :  { %v1689_v12 = vpop.f32.mrb[28].mxu0 }
0x1a2e   :  { %v1690_v35 = vadd.f32 %v1862_v9, %v1689_v12  ;;  %v2104_v13 = vpop.f32.mrb[29].mxu0 }
0x1a30   :  { %v1701_v14 = vsel %vm1700_vm10, %v1690_v35, -inf  ;;  %v1713_v15 = vmul.f32 %v1864_v10, %v1690_v35 }
0x1a31   :  { %1702 = vmax.xlane.f32.xlu1 %v1701_v14  ;;  %v1734_v37 = vrot.slane %v1701_v14, 4 }
0x1a32   :  { %v1714_v19 = vsel %vm1700_vm10, %v1713_v15, 0.0 }
0x1a33   :  { %v1735_v16 = vmax.f32 %v1701_v14, %v1734_v37 }
0x1a35   :  { %v1736_v30 = vrot.slane %v1735_v16, 2  ;;  %1715 = vadd.xlane.f32.xlu1 %v1714_v19 }
0x1a37   :  { %v1737_v27 = vmax.f32 %v1735_v16, %v1736_v30 }
0x1a39   :  { %v1738_v38 = vrot.slane %v1737_v27, 1 }
0x1a3b   :  { %v1739_v20 = vmax.f32 %v1737_v27, %v1738_v38 }
0x1a3d   :  { %v1740_v21 = vsub.f32 %v1690_v35, %v1739_v20 }
0x1a3f   :  { %v1741_v22 = vmul.f32 1.442695, %v1740_v21 }
0x1a41   :  { %2262 = vpow2.f32 %v1741_v22 }
0x1a4b   :  { %v2263_v11 = vpop.eup %2262 }
0x1a4c   :  { %v1743_v23 = vsel %vm1700_vm10, %v2263_v11, 0.0 }
0x1a4d   :  { %v1744_v24 = vrot.slane %v1743_v23, 4 }
0x1a4f   :  { %v1745_v25 = vadd.f32 %v1744_v24, %v1743_v23 }
0x1a51   :  { %v1746_v26 = vrot.slane %v1745_v25, 2 }
0x1a53   :  { %v1747_v28 = vadd.f32 %v1746_v26, %v1745_v25 }
0x1a55   :  { %v1748_v29 = vrot.slane %v1747_v28, 1 }
0x1a57   :  { %v1749_v31 = vadd.f32 %v1748_v29, %v1747_v28 }
0x1a59   :  { %2264 = vrcp.f32 %v1749_v31 }
0x1a63   :  { %v2265_v32 = vpop.eup %2264 }
0x1a64   :  { %v1751_v33 = vmul.f32 %v2265_v32, %v2263_v11 }
0x1a66   :  { %1752 = vst.msk [vmem:[#allocation4] sm:$0x3] %vm1700_vm10, %v1751_v33 }
0x1abe   :  { %v1703_v34 = vpop.xlane.xlu1 %1702 }
0x1abf   :  { %v1704_v36 = vsub.f32 %v1690_v35, %v1703_v34 }
0x1ac1   :  { %v1705_v39 = vmul.f32 1.442695, %v1704_v36 }
0x1ac2   :  { %v1716_v46 = vpop.xlane.xlu1 %1715 }
0x1ac3   :  { %2266 = vpow2.f32 %v1705_v39 }
0x1acd   :  { %v2267_v40 = vpop.eup %2266 }
0x1ace   :  { %v1707_v41 = vsel %vm1700_vm10, %v2267_v40, 0.0 }
0x1acf   :  { %1708 = vadd.xlane.f32.xlu0 %v1707_v41 }
0x1b5c   :  { %v1709_v42 = vpop.xlane.xlu0 %1708 }
0x1b5d   :  { %2268 = vlog2.f32 %v1709_v42 }
0x1b67   :  { %v2269_v43 = vpop.eup %2268 }
0x1b68   :  { %v1711_v44 = vmul.f32 0.6931472, %v2269_v43 }
0x1b6a   :  { %v1712_v45 = vadd.f32 %v1711_v44, %v1703_v34 }
0x1b6c   :  { %v1717_v47 = vsub.f32 %v1712_v45, %v1716_v46 }
0x1b6e   :  { %v1719_v48 = vsel %vm1718_vm11, %v1717_v47, 0.0 }
0x1b6f   :  { %1720 = vadd.xlane.f32.xlu1 %v1719_v48 }
0x1b70   :  { %2281 = shalt.err (!%p2278_p4)
}
0x1b71   :  { %s2282_s2 = scalar_lea.hbm %s2815_s11, 32 }
0x1b72   :  { %p2283_p5 = scmp.ne.s32.totalorder %s2815_s11, %s2282_s2  ;;  %p2286_p6 = scmp.lt.u32.totalorder %s2282_s2, %s2815_s11 }
0x1b74   :  { %p2288_p7 = pnand %p2286_p6, %p2283_p5 }
0x1b76   :  { %2291 = shalt.err (!%p2288_p7)
}
0x1b77   :  { %1772 = dma.vmem_to_hbm [thread:$0]  %s1770_s3, 32, %s2815_s11, [#allocation5]   ;;  %vm1732_vm12 = vcmask 0  }
0x1b78   :  { %s2331_s12 = smov [#allocation2]  }
0x1b79   :  { %s1759_s6 = sshll.u32 %s2331_s12, 4  ;;  %s1760_s6 = int_to_ptr.vmem [resolvable:$true] %s1759_s6 }
0x1b7a   :  { %s2292_s16 = scalar_lea.vmem %s1760_s6, 16  ;;  %s2296_s19 = scalar_lea.vmem %s1760_s6, 32 }
0x1b7b   :  { %p2293_p8 = scmp.ne.s32.totalorder %s1760_s6, %s2292_s16  ;;  %p2297_p9 = scmp.lt.s32.totalorder %s1760_s6, %s1760_s6 }
0x1b7c   :  { %p2298_p10 = scmp.lt.s32.totalorder %s2296_s19, %s2292_s16 }
0x1b7e   :  { %p2299_p11 = por %p2298_p10, %p2297_p9 }
0x1b80   :  { %p2300_p12 = pnand %p2299_p11, %p2293_p8 }
0x1bfc   :  { %v1721_v49 = vpop.xlane.xlu1 %1720 }
0x1bfd   :  { %v1722_v50 = vrot.slane %v1721_v49, 4 }
0x1bff   :  { %v1723_v51 = vadd.f32 %v1722_v50, %v1721_v49 }
0x1c01   :  { %v1724_v52 = vrot.slane %v1723_v51, 2 }
0x1c03   :  { %v1725_v53 = vadd.f32 %v1724_v52, %v1723_v51 }
0x1c05   :  { %v1726_v54 = vrot.slane %v1725_v53, 1 }
0x1c07   :  { %v1727_v55 = vadd.f32 %v1726_v54, %v1725_v53 }
0x1c09   :  { %2141 = vpush %v1727_v55 }
0x1c3a   :  { %s2142_s18 = spop %2141 }
0x1c3b   :  { %v1729_v56 = vstv %s2142_s18 }
0x1c3c   :  { %v1731_v57 = vmul.f32 0.5, %v1729_v56 }
0x1c3e   :  { %1733 = vst.msk [vmem:[#allocation2] sm:$0x1] %vm1732_vm12, %v1731_v57 }
0x1c3f   :  { %2303 = shalt.err (!%p2300_p12)
}
0x1c40   :  { %s2304_s21 = scalar_lea.hbm %s2814_s10, 16 }
0x1c41   :  { %p2305_p13 = scmp.ne.s32.totalorder %s2814_s10, %s2304_s21  ;;  %p2308_p0 = scmp.lt.u32.totalorder %s2304_s21, %s2814_s10 }
0x1c43   :  { %p2310_p1 = pnand %p2308_p0, %p2305_p13 }
0x1c45   :  { %2313 = shalt.err (!%p2310_p1)
}
0x1c46   :  { %1762 = dma.vmem_to_hbm [thread:$0]  %s1760_s6, 16, %s2814_s10, [#allocation3]  }
0x1c47   :  { %2314 = dma.done.wait [#allocation3], 16  }
0x1c48   :  { %2315 = vsyncadd [#allocation3], 4294967280 }
0x1c49   :  { %2316 = dma.done.wait [#allocation5], 32  }
0x1c4a   :  { %2317 = vsyncadd [#allocation5], 4294967264 }
0x1c4b   :  { %1779 = vsyncpa [#allocation3], 1 }
0x1c4c   :  { %1780 = vsyncpa [#allocation5], 1 }

</bundles_post_ra>
